<compile_context>
chip_gen: v7x
topology: tpu7x:2x2x1
jax: 0.10.0
libtpu: 0.0.40
codegen_flags: <defaults>
</compile_context>

<pallas_src>
import functools
import math

import jax
import jax.numpy as jnp
import numpy as np
from jax import lax
from jax.experimental import pallas as pl
from jax.experimental.pallas import tpu as pltpu


# ----------------------------------------------------------------------------
# Config parsing (straight port of the PyTorch helpers).
# ----------------------------------------------------------------------------
def parse_channel_string(s):
    channel_config = {}
    for ss in s.split(","):
        res, in_channels = ss.split(":")
        channel_config[int(res)] = int(in_channels)
    return channel_config


def parse_layer_string(s):
    layers = []
    for ss in s.split(","):
        if "x" in ss:
            res, num = ss.split("x")
            layers += [(int(res), None) for _ in range(int(num))]
        elif "u" in ss:
            res, mixin = [int(a) for a in ss.split("u")]
            layers.append((res, mixin))
        elif "d" in ss:
            res, down_rate = [int(a) for a in ss.split("d")]
            layers.append((res, down_rate))
        elif "t" in ss:
            res1, res2 = [int(a) for a in ss.split("t")]
            layers.append(((res1, res2), None))
        else:
            layers.append((int(ss), None))
    return layers


# ----------------------------------------------------------------------------
# Shared helpers.
# ----------------------------------------------------------------------------
_SQRT_2_OVER_PI = 0.7978845608028654


def _gelu(x):
    # TODO(synk): PyTorch F.gelu defaults to the exact erf form; the tanh
    # approximation is used here (and identically in the in-script reference)
    # because tanh lowers cleanly in Mosaic.
    return 0.5 * x * (1.0 + jnp.tanh(_SQRT_2_OVER_PI * (x + 0.044715 * x * x * x)))


def _batch_spec(shape):
    nd = len(shape)
    return pl.BlockSpec((1,) + tuple(shape[1:]), lambda n: (n,) + (0,) * (nd - 1))


def _const_spec(shape):
    nd = len(shape)
    return pl.BlockSpec(tuple(shape), lambda n: (0,) * nd)


_PARALLEL = pltpu.CompilerParams(dimension_semantics=("parallel",))


def _pool_matrix(h, w, d):
    """(Ho*Wo, H*W) averaging matrix for avg_pool2d(kernel=stride=d)."""
    ho, wo = h // d, w // d
    p = np.zeros((ho * wo, h * w), np.float32)
    for i in range(ho):
        for j in range(wo):
            for di in range(d):
                for dj in range(d):
                    p[i * wo + j, (i * d + di) * w + (j * d + dj)] = 1.0 / (d * d)
    return jnp.asarray(p)


# ----------------------------------------------------------------------------
# Kernels.
# ----------------------------------------------------------------------------
def _in_conv_kernel(xpad_ref, w_ref, o_ref, *, H, W):
    """3x3 conv (no bias) on a pre-padded NHWC input block, 9 shifted matmuls."""
    cin = xpad_ref.shape[-1]
    cout = w_ref.shape[-1]
    acc = jnp.zeros((H * W, cout), jnp.float32)
    for dy in range(3):
        for dx in range(3):
            patch = xpad_ref[0, dy:dy + H, dx:dx + W, :].reshape(H * W, cin)
            acc = acc + jnp.dot(patch, w_ref[dy, dx],
                                preferred_element_type=jnp.float32)
    o_ref[...] = acc.reshape(1, H, W, cout)


def _resblock_kernel(*refs, H, W, Ho, Wo, use_3x3, has_pool):
    """Fused ResBlock: 4 convs + GELUs + residual + optional avg-pool."""
    (x_ref, w1_ref, b1_ref, w2_ref, b2_ref, w3_ref, b3_ref,
     w4_ref, b4_ref) = refs[:9]
    rest = list(refs[9:])
    pool_ref = rest.pop(0) if has_pool else None
    o_ref = rest.pop(0)
    pad_ref = rest.pop(0) if use_3x3 else None

    c = x_ref.shape[-1]
    cm = w1_ref.shape[-1]

    x = x_ref[0].reshape(H * W, c)                       # single full-tile load
    h = jnp.dot(_gelu(x), w1_ref[...],
                preferred_element_type=jnp.float32) + b1_ref[...]

    if use_3x3:
        # Zero the padded scratch once; only the interior is rewritten below,
        # so the 1-pixel border stays zero for both 3x3 convs.
        pad_ref[...] = jnp.zeros_like(pad_ref)

        def conv3x3(hin, w_ref):
            pad_ref[1:H + 1, 1:W + 1, :] = hin.reshape(H, W, cm)
            acc = jnp.zeros((H * W, cm), jnp.float32)
            for dy in range(3):
                for dx in range(3):
                    patch = pad_ref[dy:dy + H, dx:dx + W, :].reshape(H * W, cm)
                    acc = acc + jnp.dot(patch, w_ref[dy, dx],
                                        preferred_element_type=jnp.float32)
            return acc

        h = conv3x3(_gelu(h), w2_ref) + b2_ref[...]
        h = conv3x3(_gelu(h), w3_ref) + b3_ref[...]
    else:
        h = jnp.dot(_gelu(h), w2_ref[...],
                    preferred_element_type=jnp.float32) + b2_ref[...]
        h = jnp.dot(_gelu(h), w3_ref[...],
                    preferred_element_type=jnp.float32) + b3_ref[...]

    xhat = jnp.dot(_gelu(h), w4_ref[...],
                   preferred_element_type=jnp.float32) + b4_ref[...]
    out = x + xhat                                        # residual add
    if has_pool:
        # avg_pool2d(kernel=stride=d) folded in as a matmul with a pooling matrix.
        out = jnp.dot(pool_ref[...], out, preferred_element_type=jnp.float32)
    o_ref[...] = out.reshape(1, Ho, Wo, c)                # one full-width store


def _pointwise_kernel(x_ref, w_ref, o_ref, *, H, W):
    """1x1 conv without bias (resolution-transition conv)."""
    cin = x_ref.shape[-1]
    cout = w_ref.shape[-1]
    x = x_ref[0].reshape(H * W, cin)
    y = jnp.dot(x, w_ref[...], preferred_element_type=jnp.float32)
    o_ref[...] = y.reshape(1, H, W, cout)


def _mu_logvar_kernel(x_ref, wm_ref, wv_ref, mu_ref, lv_ref, *, H, W):
    """Fused mu / logvar 1x1 convs (x is read once)."""
    c = x_ref.shape[-1]
    co = wm_ref.shape[-1]
    x = x_ref[0].reshape(H * W, c)
    mu_ref[...] = jnp.dot(x, wm_ref[...],
                          preferred_element_type=jnp.float32).reshape(1, H, W, co)
    lv_ref[...] = jnp.dot(x, wv_ref[...],
                          preferred_element_type=jnp.float32).reshape(1, H, W, co)


# ----------------------------------------------------------------------------
# Pallas wrappers.
# ----------------------------------------------------------------------------
def in_conv_forward(x, w):
    n, h, wdt, _ = x.shape
    cout = w.shape[-1]
    xp = jnp.pad(x, ((0, 0), (1, 1), (1, 1), (0, 0)))
    return pl.pallas_call(
        functools.partial(_in_conv_kernel, H=h, W=wdt),
        out_shape=jax.ShapeDtypeStruct((n, h, wdt, cout), jnp.float32),
        grid=(n,),
        in_specs=[_batch_spec(xp.shape), _const_spec(w.shape)],
        out_specs=_batch_spec((n, h, wdt, cout)),
        compiler_params=_PARALLEL,
    )(xp, w)


def resblock_forward(x, p):
    n, h, wdt, c = x.shape
    cm = p["w1"].shape[-1]
    use_3x3 = p["use_3x3"]
    down = p["down_rate"]
    if down is not None:
        ho, wo = h // down, wdt // down
        pool = _pool_matrix(h, wdt, down)
    else:
        ho, wo = h, wdt
        pool = None

    inputs = [x, p["w1"], p["b1"], p["w2"], p["b2"], p["w3"], p["b3"],
              p["w4"], p["b4"]]
    if pool is not None:
        inputs.append(pool)
    in_specs = [_batch_spec(x.shape)] + [_const_spec(a.shape) for a in inputs[1:]]
    scratch = [pltpu.VMEM((h + 2, wdt + 2, cm), jnp.float32)] if use_3x3 else []

    return pl.pallas_call(
        functools.partial(_resblock_kernel, H=h, W=wdt, Ho=ho, Wo=wo,
                          use_3x3=use_3x3, has_pool=pool is not None),
        out_shape=jax.ShapeDtypeStruct((n, ho, wo, c), jnp.float32),
        grid=(n,),
        in_specs=in_specs,
        out_specs=_batch_spec((n, ho, wo, c)),
        scratch_shapes=scratch,
        compiler_params=_PARALLEL,
    )(*inputs)


def pointwise_conv_forward(x, w):
    n, h, wdt, _ = x.shape
    cout = w.shape[-1]
    return pl.pallas_call(
        functools.partial(_pointwise_kernel, H=h, W=wdt),
        out_shape=jax.ShapeDtypeStruct((n, h, wdt, cout), jnp.float32),
        grid=(n,),
        in_specs=[_batch_spec(x.shape), _const_spec(w.shape)],
        out_specs=_batch_spec((n, h, wdt, cout)),
        compiler_params=_PARALLEL,
    )(x, w)


def mu_logvar_forward(x, wm, wv):
    n, h, wdt, _ = x.shape
    co = wm.shape[-1]
    out_sd = jax.ShapeDtypeStruct((n, h, wdt, co), jnp.float32)
    return pl.pallas_call(
        functools.partial(_mu_logvar_kernel, H=h, W=wdt),
        out_shape=(out_sd, out_sd),
        grid=(n,),
        in_specs=[_batch_spec(x.shape), _const_spec(wm.shape),
                  _const_spec(wv.shape)],
        out_specs=(_batch_spec((n, h, wdt, co)), _batch_spec((n, h, wdt, co))),
        compiler_params=_PARALLEL,
    )(x, wm, wv)


def encoder_forward_pallas(x_nchw, params):
    # NCHW -> NHWC in the wrapper (layout plumbing): channels on the lane axis.
    x = jnp.transpose(x_nchw, (0, 2, 3, 1))
    x = in_conv_forward(x, params["in_conv_w"])
    for blk in params["blocks"]:
        if blk["kind"] == "trans":
            x = pointwise_conv_forward(x, blk["w"])
        else:
            x = resblock_forward(x, blk)
    mu, logvar = mu_logvar_forward(x, params["mu_w"], params["logvar_w"])
    to_nchw = lambda t: jnp.transpose(t, (0, 3, 1, 2))
    return to_nchw(mu), to_nchw(logvar)


# ----------------------------------------------------------------------------
# Parameter init (mirrors PyTorch Conv2d default init; zero_bias=True => b=0).
# Weights stored in matmul layout: 1x1 -> (Cin, Cout), 3x3 -> (3, 3, Cin, Cout).
# ----------------------------------------------------------------------------
def init_encoder_params(key, block_config_str, channel_config_str):
    block_config = parse_layer_string(block_config_str)
    channel_config = parse_channel_string(channel_config_str)
    keys = iter(jax.random.split(key, 128))

    def w3x3(cin, cout):
        bound = 1.0 / math.sqrt(cin * 9)
        return jax.random.uniform(next(keys), (3, 3, cin, cout), jnp.float32,
                                  -bound, bound)

    def w1x1(cin, cout):
        bound = 1.0 / math.sqrt(cin)
        return jax.random.uniform(next(keys), (cin, cout), jnp.float32,
                                  -bound, bound)

    params = {"in_conv_w": w3x3(3, 64)}  # nn.Conv2d(3, 64, 3, 1, 1, bias=False)
    blocks = []
    for res, down_rate in block_config:
        if isinstance(res, tuple):
            r1, r2 = res
            blocks.append({"kind": "trans",
                           "w": w1x1(channel_config[r1], channel_config[r2])})
            continue
        c = channel_config[res]
        cm = int(0.5 * c)
        use_3x3 = res > 1
        blocks.append({
            "kind": "res", "use_3x3": use_3x3, "down_rate": down_rate,
            "w1": w1x1(c, cm), "b1": jnp.zeros((1, cm), jnp.float32),
            "w2": w3x3(cm, cm) if use_3x3 else w1x1(cm, cm),
            "b2": jnp.zeros((1, cm), jnp.float32),
            "w3": w3x3(cm, cm) if use_3x3 else w1x1(cm, cm),
            "b3": jnp.zeros((1, cm), jnp.float32),
            "w4": w1x1(cm, c), "b4": jnp.zeros((1, c), jnp.float32),
        })
    params["blocks"] = blocks
    c1 = channel_config[1]
    params["mu_w"] = w1x1(c1, c1)
    params["logvar_w"] = w1x1(c1, c1)
    return params


# ----------------------------------------------------------------------------
# Pure-JAX reference (XLA convs, HIGHEST precision) for validation.
# ----------------------------------------------------------------------------
def _conv3x3_nhwc_ref(x, w):
    return lax.conv_general_dilated(
        x, w, window_strides=(1, 1), padding=((1, 1), (1, 1)),
        dimension_numbers=("NHWC", "HWIO", "NHWC"),
        precision=lax.Precision.HIGHEST)


def _conv1x1_nhwc_ref(x, w):
    return jnp.einsum("nhwi,io->nhwo", x, w, precision=lax.Precision.HIGHEST)


def _resblock_ref(x, p):
    def bias(b):
        return b.reshape(1, 1, 1, -1)
    h = _conv1x1_nhwc_ref(_gelu(x), p["w1"]) + bias(p["b1"])
    if p["use_3x3"]:
        h = _conv3x3_nhwc_ref(_gelu(h), p["w2"]) + bias(p["b2"])
        h = _conv3x3_nhwc_ref(_gelu(h), p["w3"]) + bias(p["b3"])
    else:
        h = _conv1x1_nhwc_ref(_gelu(h), p["w2"]) + bias(p["b2"])
        h = _conv1x1_nhwc_ref(_gelu(h), p["w3"]) + bias(p["b3"])
    xhat = _conv1x1_nhwc_ref(_gelu(h), p["w4"]) + bias(p["b4"])
    out = x + xhat
    d = p["down_rate"]
    if d is not None:
        n, h_, w_, c = out.shape
        out = out.reshape(n, h_ // d, d, w_ // d, d, c).mean(axis=(2, 4))
    return out


def encoder_forward_ref(x_nchw, params):
    x = jnp.transpose(x_nchw, (0, 2, 3, 1))
    x = _conv3x3_nhwc_ref(x, params["in_conv_w"])
    for blk in params["blocks"]:
        if blk["kind"] == "trans":
            x = _conv1x1_nhwc_ref(x, blk["w"])
        else:
            x = _resblock_ref(x, blk)
    mu = _conv1x1_nhwc_ref(x, params["mu_w"])
    logvar = _conv1x1_nhwc_ref(x, params["logvar_w"])
    to_nchw = lambda t: jnp.transpose(t, (0, 3, 1, 2))
    return to_nchw(mu), to_nchw(logvar)


# ----------------------------------------------------------------------------
if __name__ == "__main__":
    # Small demo config: 16x16 RGB input; channels 64 -> 32 -> 16, spatial
    # 16 -> 8 -> 1.  The first channel entry must be 64 to match the fixed
    # in_conv of the module.
    block_config_str = "16x1,16d2,16t8,8x1,8d8,8t1,1x1"
    channel_config_str = "16:64,8:32,1:16"

    key = jax.random.PRNGKey(0)
    kx, kp = jax.random.split(key)
    x = jax.random.normal(kx, (2, 3, 16, 16), jnp.float32)  # NCHW, like PyTorch
    params = init_encoder_params(kp, block_config_str, channel_config_str)

    mu, logvar = encoder_forward_pallas(x, params)
    mu = jax.block_until_ready(mu)
    logvar = jax.block_until_ready(logvar)

    mu_ref, logvar_ref = encoder_forward_ref(x, params)
    err_mu = float(jnp.max(jnp.abs(mu - mu_ref)))
    err_lv = float(jnp.max(jnp.abs(logvar - logvar_ref)))
    assert jnp.allclose(mu, mu_ref, atol=2e-3, rtol=2e-3), f"mu mismatch {err_mu}"
    assert jnp.allclose(logvar, logvar_ref, atol=2e-3, rtol=2e-3), (
        f"logvar mismatch {err_lv}")

    print("KERNEL_OK")
</pallas_src>

<mosaic_0001>
module attributes {stable_mosaic.version = 11 : i64} {
  func.func @_in_conv_kernel(%arg0: i32, %arg1: memref<1x18x18x3xf32, #tpu.memory_space<vmem>>, %arg2: memref<3x3x3x64xf32, #tpu.memory_space<vmem>>, %arg3: memref<1x16x16x64xf32, #tpu.memory_space<vmem>>) attributes {dimension_semantics = [#tpu.dimension_semantics<parallel>], iteration_bounds = array<i64: 2>, scalar_prefetch = 0 : i64, scratch_operands = 0 : i64, tpu.core_type = #tpu.core_type<tc>, window_params = [{transform_indices = @transform_0, window_bounds = array<i64: 1, 18, 18, 3>}, {pipeline_mode = #tpu.pipeline_mode<synchronous>, transform_indices = @transform_1, window_bounds = array<i64: 3, 3, 3, 64>}, {transform_indices = @transform_2, window_bounds = array<i64: 1, 16, 16, 64>}]} {
    %cst = arith.constant 0.000000e+00 : f32
    %0 = vector.broadcast %cst : f32 to vector<256x64xf32>
    %c0 = arith.constant 0 : index
    %c0_0 = arith.constant 0 : index
    %c0_1 = arith.constant 0 : index
    %c0_2 = arith.constant 0 : index
    %1 = vector.load %arg1[%c0, %c0_0, %c0_1, %c0_2] : memref<1x18x18x3xf32, #tpu.memory_space<vmem>>, vector<1x16x16x3xf32>
    %2 = vector.shape_cast %1 : vector<1x16x16x3xf32> to vector<16x16x3xf32>
    %3 = vector.shape_cast %2 : vector<16x16x3xf32> to vector<256x3xf32>
    %c0_3 = arith.constant 0 : index
    %c0_4 = arith.constant 0 : index
    %c0_5 = arith.constant 0 : index
    %c0_6 = arith.constant 0 : index
    %4 = vector.load %arg2[%c0_3, %c0_4, %c0_5, %c0_6] : memref<3x3x3x64xf32, #tpu.memory_space<vmem>>, vector<1x1x3x64xf32>
    %5 = vector.shape_cast %4 : vector<1x1x3x64xf32> to vector<3x64xf32>
    %cst_7 = arith.constant dense<0.000000e+00> : vector<256x64xf32>
    %6 = tpu.matmul %3, %5, %cst_7 {dimension_numbers = #tpu.dot_dimension_numbers<[1], [0], [0], [1], [0, 0, 1, 1], [], []>} : vector<256x3xf32>, vector<3x64xf32>, vector<256x64xf32> -> vector<256x64xf32>
    %7 = arith.addf %0, %6 : vector<256x64xf32>
    %c0_8 = arith.constant 0 : index
    %c0_9 = arith.constant 0 : index
    %c1 = arith.constant 1 : index
    %c0_10 = arith.constant 0 : index
    %8 = vector.load %arg1[%c0_8, %c0_9, %c1, %c0_10] : memref<1x18x18x3xf32, #tpu.memory_space<vmem>>, vector<1x16x16x3xf32>
    %9 = vector.shape_cast %8 : vector<1x16x16x3xf32> to vector<16x16x3xf32>
    %10 = vector.shape_cast %9 : vector<16x16x3xf32> to vector<256x3xf32>
    %c0_11 = arith.constant 0 : index
    %c1_12 = arith.constant 1 : index
    %c0_13 = arith.constant 0 : index
    %c0_14 = arith.constant 0 : index
    %11 = vector.load %arg2[%c0_11, %c1_12, %c0_13, %c0_14] : memref<3x3x3x64xf32, #tpu.memory_space<vmem>>, vector<1x1x3x64xf32>
    %12 = vector.shape_cast %11 : vector<1x1x3x64xf32> to vector<3x64xf32>
    %cst_15 = arith.constant dense<0.000000e+00> : vector<256x64xf32>
    %13 = tpu.matmul %10, %12, %cst_15 {dimension_numbers = #tpu.dot_dimension_numbers<[1], [0], [0], [1], [0, 0, 1, 1], [], []>} : vector<256x3xf32>, vector<3x64xf32>, vector<256x64xf32> -> vector<256x64xf32>
    %14 = arith.addf %7, %13 : vector<256x64xf32>
    %c0_16 = arith.constant 0 : index
    %c0_17 = arith.constant 0 : index
    %c2 = arith.constant 2 : index
    %c0_18 = arith.constant 0 : index
    %15 = vector.load %arg1[%c0_16, %c0_17, %c2, %c0_18] : memref<1x18x18x3xf32, #tpu.memory_space<vmem>>, vector<1x16x16x3xf32>
    %16 = vector.shape_cast %15 : vector<1x16x16x3xf32> to vector<16x16x3xf32>
    %17 = vector.shape_cast %16 : vector<16x16x3xf32> to vector<256x3xf32>
    %c0_19 = arith.constant 0 : index
    %c2_20 = arith.constant 2 : index
    %c0_21 = arith.constant 0 : index
    %c0_22 = arith.constant 0 : index
    %18 = vector.load %arg2[%c0_19, %c2_20, %c0_21, %c0_22] : memref<3x3x3x64xf32, #tpu.memory_space<vmem>>, vector<1x1x3x64xf32>
    %19 = vector.shape_cast %18 : vector<1x1x3x64xf32> to vector<3x64xf32>
    %cst_23 = arith.constant dense<0.000000e+00> : vector<256x64xf32>
    %20 = tpu.matmul %17, %19, %cst_23 {dimension_numbers = #tpu.dot_dimension_numbers<[1], [0], [0], [1], [0, 0, 1, 1], [], []>} : vector<256x3xf32>, vector<3x64xf32>, vector<256x64xf32> -> vector<256x64xf32>
    %21 = arith.addf %14, %20 : vector<256x64xf32>
    %c0_24 = arith.constant 0 : index
    %c1_25 = arith.constant 1 : index
    %c0_26 = arith.constant 0 : index
    %c0_27 = arith.constant 0 : index
    %22 = vector.load %arg1[%c0_24, %c1_25, %c0_26, %c0_27] : memref<1x18x18x3xf32, #tpu.memory_space<vmem>>, vector<1x16x16x3xf32>
    %23 = vector.shape_cast %22 : vector<1x16x16x3xf32> to vector<16x16x3xf32>
    %24 = vector.shape_cast %23 : vector<16x16x3xf32> to vector<256x3xf32>
    %c1_28 = arith.constant 1 : index
    %c0_29 = arith.constant 0 : index
    %c0_30 = arith.constant 0 : index
    %c0_31 = arith.constant 0 : index
    %25 = vector.load %arg2[%c1_28, %c0_29, %c0_30, %c0_31] : memref<3x3x3x64xf32, #tpu.memory_space<vmem>>, vector<1x1x3x64xf32>
    %26 = vector.shape_cast %25 : vector<1x1x3x64xf32> to vector<3x64xf32>
    %cst_32 = arith.constant dense<0.000000e+00> : vector<256x64xf32>
    %27 = tpu.matmul %24, %26, %cst_32 {dimension_numbers = #tpu.dot_dimension_numbers<[1], [0], [0], [1], [0, 0, 1, 1], [], []>} : vector<256x3xf32>, vector<3x64xf32>, vector<256x64xf32> -> vector<256x64xf32>
    %28 = arith.addf %21, %27 : vector<256x64xf32>
    %c0_33 = arith.constant 0 : index
    %c1_34 = arith.constant 1 : index
    %c1_35 = arith.constant 1 : index
    %c0_36 = arith.constant 0 : index
    %29 = vector.load %arg1[%c0_33, %c1_34, %c1_35, %c0_36] : memref<1x18x18x3xf32, #tpu.memory_space<vmem>>, vector<1x16x16x3xf32>
    %30 = vector.shape_cast %29 : vector<1x16x16x3xf32> to vector<16x16x3xf32>
    %31 = vector.shape_cast %30 : vector<16x16x3xf32> to vector<256x3xf32>
    %c1_37 = arith.constant 1 : index
    %c1_38 = arith.constant 1 : index
    %c0_39 = arith.constant 0 : index
    %c0_40 = arith.constant 0 : index
    %32 = vector.load %arg2[%c1_37, %c1_38, %c0_39, %c0_40] : memref<3x3x3x64xf32, #tpu.memory_space<vmem>>, vector<1x1x3x64xf32>
    %33 = vector.shape_cast %32 : vector<1x1x3x64xf32> to vector<3x64xf32>
    %cst_41 = arith.constant dense<0.000000e+00> : vector<256x64xf32>
    %34 = tpu.matmul %31, %33, %cst_41 {dimension_numbers = #tpu.dot_dimension_numbers<[1], [0], [0], [1], [0, 0, 1, 1], [], []>} : vector<256x3xf32>, vector<3x64xf32>, vector<256x64xf32> -> vector<256x64xf32>
    %35 = arith.addf %28, %34 : vector<256x64xf32>
    %c0_42 = arith.constant 0 : index
    %c1_43 = arith.constant 1 : index
    %c2_44 = arith.constant 2 : index
    %c0_45 = arith.constant 0 : index
    %36 = vector.load %arg1[%c0_42, %c1_43, %c2_44, %c0_45] : memref<1x18x18x3xf32, #tpu.memory_space<vmem>>, vector<1x16x16x3xf32>
    %37 = vector.shape_cast %36 : vector<1x16x16x3xf32> to vector<16x16x3xf32>
    %38 = vector.shape_cast %37 : vector<16x16x3xf32> to vector<256x3xf32>
    %c1_46 = arith.constant 1 : index
    %c2_47 = arith.constant 2 : index
    %c0_48 = arith.constant 0 : index
    %c0_49 = arith.constant 0 : index
    %39 = vector.load %arg2[%c1_46, %c2_47, %c0_48, %c0_49] : memref<3x3x3x64xf32, #tpu.memory_space<vmem>>, vector<1x1x3x64xf32>
    %40 = vector.shape_cast %39 : vector<1x1x3x64xf32> to vector<3x64xf32>
    %cst_50 = arith.constant dense<0.000000e+00> : vector<256x64xf32>
    %41 = tpu.matmul %38, %40, %cst_50 {dimension_numbers = #tpu.dot_dimension_numbers<[1], [0], [0], [1], [0, 0, 1, 1], [], []>} : vector<256x3xf32>, vector<3x64xf32>, vector<256x64xf32> -> vector<256x64xf32>
    %42 = arith.addf %35, %41 : vector<256x64xf32>
    %c0_51 = arith.constant 0 : index
    %c2_52 = arith.constant 2 : index
    %c0_53 = arith.constant 0 : index
    %c0_54 = arith.constant 0 : index
    %43 = vector.load %arg1[%c0_51, %c2_52, %c0_53, %c0_54] : memref<1x18x18x3xf32, #tpu.memory_space<vmem>>, vector<1x16x16x3xf32>
    %44 = vector.shape_cast %43 : vector<1x16x16x3xf32> to vector<16x16x3xf32>
    %45 = vector.shape_cast %44 : vector<16x16x3xf32> to vector<256x3xf32>
    %c2_55 = arith.constant 2 : index
    %c0_56 = arith.constant 0 : index
    %c0_57 = arith.constant 0 : index
    %c0_58 = arith.constant 0 : index
    %46 = vector.load %arg2[%c2_55, %c0_56, %c0_57, %c0_58] : memref<3x3x3x64xf32, #tpu.memory_space<vmem>>, vector<1x1x3x64xf32>
    %47 = vector.shape_cast %46 : vector<1x1x3x64xf32> to vector<3x64xf32>
    %cst_59 = arith.constant dense<0.000000e+00> : vector<256x64xf32>
    %48 = tpu.matmul %45, %47, %cst_59 {dimension_numbers = #tpu.dot_dimension_numbers<[1], [0], [0], [1], [0, 0, 1, 1], [], []>} : vector<256x3xf32>, vector<3x64xf32>, vector<256x64xf32> -> vector<256x64xf32>
    %49 = arith.addf %42, %48 : vector<256x64xf32>
    %c0_60 = arith.constant 0 : index
    %c2_61 = arith.constant 2 : index
    %c1_62 = arith.constant 1 : index
    %c0_63 = arith.constant 0 : index
    %50 = vector.load %arg1[%c0_60, %c2_61, %c1_62, %c0_63] : memref<1x18x18x3xf32, #tpu.memory_space<vmem>>, vector<1x16x16x3xf32>
    %51 = vector.shape_cast %50 : vector<1x16x16x3xf32> to vector<16x16x3xf32>
    %52 = vector.shape_cast %51 : vector<16x16x3xf32> to vector<256x3xf32>
    %c2_64 = arith.constant 2 : index
    %c1_65 = arith.constant 1 : index
    %c0_66 = arith.constant 0 : index
    %c0_67 = arith.constant 0 : index
    %53 = vector.load %arg2[%c2_64, %c1_65, %c0_66, %c0_67] : memref<3x3x3x64xf32, #tpu.memory_space<vmem>>, vector<1x1x3x64xf32>
    %54 = vector.shape_cast %53 : vector<1x1x3x64xf32> to vector<3x64xf32>
    %cst_68 = arith.constant dense<0.000000e+00> : vector<256x64xf32>
    %55 = tpu.matmul %52, %54, %cst_68 {dimension_numbers = #tpu.dot_dimension_numbers<[1], [0], [0], [1], [0, 0, 1, 1], [], []>} : vector<256x3xf32>, vector<3x64xf32>, vector<256x64xf32> -> vector<256x64xf32>
    %56 = arith.addf %49, %55 : vector<256x64xf32>
    %c0_69 = arith.constant 0 : index
    %c2_70 = arith.constant 2 : index
    %c2_71 = arith.constant 2 : index
    %c0_72 = arith.constant 0 : index
    %57 = vector.load %arg1[%c0_69, %c2_70, %c2_71, %c0_72] : memref<1x18x18x3xf32, #tpu.memory_space<vmem>>, vector<1x16x16x3xf32>
    %58 = vector.shape_cast %57 : vector<1x16x16x3xf32> to vector<16x16x3xf32>
    %59 = vector.shape_cast %58 : vector<16x16x3xf32> to vector<256x3xf32>
    %c2_73 = arith.constant 2 : index
    %c2_74 = arith.constant 2 : index
    %c0_75 = arith.constant 0 : index
    %c0_76 = arith.constant 0 : index
    %60 = vector.load %arg2[%c2_73, %c2_74, %c0_75, %c0_76] : memref<3x3x3x64xf32, #tpu.memory_space<vmem>>, vector<1x1x3x64xf32>
    %61 = vector.shape_cast %60 : vector<1x1x3x64xf32> to vector<3x64xf32>
    %cst_77 = arith.constant dense<0.000000e+00> : vector<256x64xf32>
    %62 = tpu.matmul %59, %61, %cst_77 {dimension_numbers = #tpu.dot_dimension_numbers<[1], [0], [0], [1], [0, 0, 1, 1], [], []>} : vector<256x3xf32>, vector<3x64xf32>, vector<256x64xf32> -> vector<256x64xf32>
    %63 = arith.addf %56, %62 : vector<256x64xf32>
    %64 = vector.shape_cast %63 : vector<256x64xf32> to vector<1x16x16x64xf32>
    %c0_78 = arith.constant 0 : index
    %c0_79 = arith.constant 0 : index
    %c0_80 = arith.constant 0 : index
    %c0_81 = arith.constant 0 : index
    %65 = vector.load %arg3[%c0_78, %c0_79, %c0_80, %c0_81] : memref<1x16x16x64xf32, #tpu.memory_space<vmem>>, vector<1x16x16x64xf32>
    tpu.vector_store %arg3[%c0_78, %c0_79, %c0_80, %c0_81], %64 {strides = array<i32>} : memref<1x16x16x64xf32, #tpu.memory_space<vmem>>, vector<1x16x16x64xf32>,
    return
  }
  func.func @transform_0(%arg0: i32) -> (i32, i32, i32, i32) {
    %c0_i32 = arith.constant 0 : i32
    %c0_i32_0 = arith.constant 0 : i32
    %c0_i32_1 = arith.constant 0 : i32
    %c0_i32_2 = arith.constant 0 : i32
    return %arg0, %c0_i32, %c0_i32_0, %c0_i32_1 : i32, i32, i32, i32
  }
  func.func @transform_1(%arg0: i32) -> (i32, i32, i32, i32) {
    %c0_i32 = arith.constant 0 : i32
    %c0_i32_0 = arith.constant 0 : i32
    %c0_i32_1 = arith.constant 0 : i32
    %c0_i32_2 = arith.constant 0 : i32
    %c0_i32_3 = arith.constant 0 : i32
    return %c0_i32, %c0_i32_0, %c0_i32_1, %c0_i32_2 : i32, i32, i32, i32
  }
  func.func @transform_2(%arg0: i32) -> (i32, i32, i32, i32) {
    %c0_i32 = arith.constant 0 : i32
    %c0_i32_0 = arith.constant 0 : i32
    %c0_i32_1 = arith.constant 0 : i32
    %c0_i32_2 = arith.constant 0 : i32
    return %arg0, %c0_i32, %c0_i32_0, %c0_i32_1 : i32, i32, i32, i32
  }
}

</mosaic_0001>

<bundles_post_ra>
// kernel: tpu_custom_call.1
= control target key start
LH: loop header
LB: loop body
LE: loop exit
PB: predicated region body
PF: predicated region fallthrough
CT: control target
= control target key end

     0   :  { %7 = vsyncpa [#allocation3], 0  ;;  %s6439_s0 = inlined_call_operand.vmem [shape: f32[2,18,18,3], index: 0, kind: input, shape index: {}]   ;;  %s6440_s1 = inlined_call_operand.vmem [shape: f32[3,3,3,64], index: 1, kind: input, shape index: {}]   ;;  %s6441_s2 = inlined_call_operand.hbm [shape: f32[2,16,16,64], index: 2, kind: output, shape index: {}]  }
   0x1   :  { %9 = vsyncpa [#allocation3 + $0x1], 0  ;;  %s5338_s9 = smov 0   ;;  %s5340_s10 = smov 0  }
   0x2   :  { %s5342_s11 = smov 0   ;;  %s5344_s12 = smov 0  }
   0x3 LB: > { %s5359_s13 = sadd.s32 4294967295, %s5318_s12   ;;  %s3700_s14 = sadd.s32 4294967294, %s5318_s12   ;;  %s5318_s12 = sphi %s5344_s12, %s6556_s12   ;;  %s5314_s11 = sphi %s5342_s11, %s6555_s11   ;;  %s5310_s10 = sphi %s5340_s10, %s6554_s10   ;;  %s5306_s9 = sphi %s5338_s9, %s6553_s9  }
   0x4   : > { %s5363_s15 = sadd.s32 1, %s5318_s12   ;;  %s69_s16 = sadd.s32 1, %s5314_s11 }
   0x5   : > { %s66_s17 = ssub.s32 %s5318_s12, %s5363_s15  ;;  %p79_p0 = scmp.ne.s32.totalorder %s5314_s11, %s5310_s10 }
   0x6   : > { %p67_p1 = scmp.eq.s32.totalorder %s66_s17, 0  ;;  %p80_p2 = scmp.eq.s32.totalorder %s5359_s13, 1 }
   0x7   : > { %p85_p3 = scmp.ne.s32.totalorder %s5310_s10, %s5306_s9  ;;  %p86_p4 = scmp.eq.s32.totalorder %s3700_s14, 1 }
   0x8   : > { %s5374_s18 = scalar_select %p67_p1, %s5314_s11, %s69_s16  }
   0x9   : > { %p5376_p5 = por %p80_p2, %p79_p0  ;;  %p5380_p6 = por %p86_p4, %p85_p3 }
   0xa   : > { %p3703_p7 = scmp.ge.s32.totalorder %s5318_s12, 1  ;;  %p115_p8 = scmp.lt.s32.totalorder %s5318_s12, 3 }
   0xc   : > { %p116_p9 = pnand %p3703_p7, %p115_p8 }
   0xe   : > { %119 = sbr.rel (%p116_p9) target bundleno = 544 (0x220), region = 28 }
  0x15   : > { %v3706_v0 = vld [vmem:[%s6440_s1 + $0x4] sm:$0x7]  ;;  %vm306_vm0 = vcmask 1042432   ;;  %v5392_v1 = vld [vmem:[%s6440_s1 + $0x10] sm:$0x7]  ;;  %p137_p10 = scmp.lt.s32.totalorder %s5359_s13, 1 }
  0x16   : > { %4506 = vmatprep.subr.msk.mxu1 %vm306_vm0, %v3706_v0  ;;  %4706 = vmatprep.subr.msk.mxu0 %vm306_vm0, %v5392_v1  ;;  %v174_v2 = vld [vmem:[%s6440_s1] sm:$0x7]  ;;  %v3971_v3 = vld [vmem:[%s6440_s1 + $0x14] sm:$0x7]  ;;  %vm209_vm1 = vcmask 23552   ;;  %s134_s25 = sand.u32 1, %s5310_s10  }
  0x17   : > { %4507 = vmatpush3.msk.msra.mxu1 %vm306_vm0, %v3706_v0  ;;  %4707 = vmatpush3.msk.msra.mxu0 %vm306_vm0, %v5392_v1  ;;  %s138_s29 = scalar_select %p137_p10, %s5359_s13, 1  ;;  %v4037_v9 = vld [vmem:[%s6440_s1 + $0x18] sm:$0x7]  ;;  %v5432_v10 = vld [vmem:[%s6440_s1 + $0x8] sm:$0x7]  ;;  %vm3591_vm2 = vcmask 523264  }
  0x18   : > { %4556 = vmatprep.subr.msk.mxu1 %vm306_vm0, %v174_v2  ;;  %4756 = vmatprep.subr.msk.mxu0 %vm306_vm0, %v3971_v3  ;;  %v5551_v28 = vld [vmem:[%s6440_s1 + $0x1c] sm:$0x7]  ;;  %v5714_v61 = vld [vmem:[%s6440_s1 + $0xc] sm:$0x7]  ;;  %s3704_s26 = sshll.u32 %s134_s25, 8  ;;  %s4208_s28 = sshll.u32 %s5359_s13, 12 }
  0x19   : > { %s5214_s30 = smul.u32 432, %s138_s29  ;;  %s6321_s27 = scalar_lea.vmem [#allocation2], %s3704_s26 }
  0x1a   : > { %s3638_s29 = sshll.u32 %s6321_s27, 4  ;;  %s6388_s4 = scalar_lea.hbm %s6441_s2, %s4208_s28  ;;  %s6390_s29 = int_to_ptr.vmem [resolvable:$true] %s3638_s29 }
  0x1b   : > { %s5413_s5 = scalar_lea.vmem %s6439_s0, %s5214_s30  ;;  %s6398_s13 = scalar_lea.sflag [#allocation3], %s134_s25 }
  0x1c   : > { %v175_v4 = vld [vmem:[%s5413_s5 + $0x1] sm:$0xff]  ;;  %v3873_v5 = vld [vmem:[%s5413_s5 + $0x19] sm:$0xff]  ;;  %v176_v6 = vld [vmem:[%s5413_s5 + $0x9] sm:$0xff]  ;;  %s5320_s6 = smov [#allocation2]  }
  0x1d   : > { %4508 = vmatprep.mubr.msk.f32.mxu1 %vm209_vm1, %v175_v4  ;;  %4708 = vmatprep.mubr.msk.f32.mxu0 %vm209_vm1, %v3873_v5  ;;  %v3874_v7 = vld [vmem:[%s5413_s5 + $0x21] sm:$0xff]  ;;  %v5422_v8 = vld [vmem:[%s5413_s5 + $0x31] sm:$0xff]  ;;  %v5437_v11 = vld [vmem:[%s5413_s5 + $0x39] sm:$0xff]  ;;  %s5260_s7 = sshll.u32 %s5320_s6, 4  ;;  %s5261_s7 = int_to_ptr.vmem [resolvable:$false] %s5260_s7 }
  0x1e   : > { %4509 = vmatmul.mubr.msk.f32.vlgmr.msra.gmra.mrb[0].mxu1 %vm209_vm1, %v176_v6  ;;  %4709 = vmatmul.mubr.msk.f32.vlgmr.msra.gmra.mrb[0].mxu0 %vm209_vm1, %v3874_v7  ;;  %v5443_v12 = vld [vmem:[%s5413_s5 + $0x49] sm:$0xff]  ;;  %v5456_v13 = vld [vmem:[%s5413_s5 + $0x51] sm:$0xff]  ;;  %v5459_v14 = vld [vmem:[%s5413_s5 + $0x61] sm:$0xff]  ;;  %s5262_s8 = scalar_lea.vmem %s5261_s7, 8192  ;;  %p5263_p0 = scmp.lt.s32.totalorder %s6390_s29, %s5261_s7 }
  0x1f   : > { %4557 = vmatpush3.msk.msra.mxu1 %vm306_vm0, %v174_v2  ;;  %4757 = vmatpush3.msk.msra.mxu0 %vm306_vm0, %v3971_v3  ;;  %v5470_v15 = vld [vmem:[%s5413_s5 + $0x69] sm:$0xff]  ;;  %v5473_v16 = vld [vmem:[%s5413_s5 + $0x79] sm:$0xff]  ;;  %v5484_v17 = vld [vmem:[%s5413_s5 + $0x81] sm:$0xff] }
  0x20   : > { %4511 = vmatprep.mubr.msk.f32.mxu1 %vm209_vm1, %v3873_v5  ;;  %4711 = vmatprep.mubr.msk.f32.mxu0 %vm209_vm1, %v5422_v8  ;;  %v5487_v18 = vld [vmem:[%s5413_s5 + $0x91] sm:$0xff]  ;;  %v5498_v19 = vld [vmem:[%s5413_s5 + $0x99] sm:$0xff]  ;;  %v5501_v20 = vld [vmem:[%s5413_s5 + $0xa9] sm:$0xff] }
  0x21   : > { %4806 = vmatprep.subr.msk.mxu0 %vm306_vm0, %v4037_v9  ;;  %4606 = vmatprep.subr.msk.mxu1 %vm306_vm0, %v5432_v10  ;;  %v5512_v21 = vld [vmem:[%s5413_s5 + $0xb1] sm:$0xff]  ;;  %v5515_v22 = vld [vmem:[%s5413_s5 + $0xc1] sm:$0xff]  ;;  %v5526_v23 = vld [vmem:[%s5413_s5 + $0xc9] sm:$0xff] }
  0x22   : > { %4512 = vmatmul.mubr.msk.f32.gmra.mrb[2].mxu1 %vm209_vm1, %v3874_v7  ;;  %4712 = vmatmul.mubr.msk.f32.gmra.mrb[2].mxu0 %vm209_vm1, %v5437_v11  ;;  %v5529_v24 = vld [vmem:[%s5413_s5 + $0x1a] sm:$0xff]  ;;  %v5540_v25 = vld [vmem:[%s5413_s5 + $0x22] sm:$0xff]  ;;  %v5546_v27 = vld [vmem:[%s5413_s5 + $0x32] sm:$0xff] }
  0x23   : > { %4514 = vmatprep.mubr.msk.f32.mxu1 %vm209_vm1, %v5422_v8  ;;  %4714 = vmatprep.mubr.msk.f32.mxu0 %vm209_vm1, %v5443_v12  ;;  %v5543_v26 = vld [vmem:[%s5413_s5 + $0xd9] sm:$0xff]  ;;  %v5561_v29 = vld [vmem:[%s5413_s5 + $0xe1] sm:$0xff]  ;;  %v5569_v31 = vld [vmem:[%s5413_s5 + $0xf1] sm:$0xff] }
  0x24   : > { %6489 = vst [vmem:[#allocation5_spill] sm:$0xff] %v5561_v29  ;;  %v5564_v30 = vld [vmem:[%s5413_s5 + $0x3a] sm:$0xff]  ;;  %6490 = vst [vmem:[#allocation6_spill] sm:$0xff] %v5569_v31  ;;  %v5572_v32 = vld [vmem:[%s5413_s5 + $0x4a] sm:$0xff] }
  0x25   : > { %v5585_v33 = vld [vmem:[%s5413_s5 + $0xf9] sm:$0xff]  ;;  %v5591_v35 = vld [vmem:[%s5413_s5 + $0x109] sm:$0xff]  ;;  %v5605_v37 = vld [vmem:[%s5413_s5 + $0x111] sm:$0xff] }
  0x26   : > { %4515 = vmatmul.mubr.msk.f32.gmra.mrb[4].mxu1 %vm209_vm1, %v5437_v11  ;;  %4715 = vmatmul.mubr.msk.f32.gmra.mrb[4].mxu0 %vm209_vm1, %v5456_v13  ;;  %6491 = vst [vmem:[#allocation7_spill] sm:$0xff] %v5585_v33  ;;  %v5588_v34 = vld [vmem:[%s5413_s5 + $0x52] sm:$0xff]  ;;  %6492 = vst [vmem:[#allocation8_spill] sm:$0xff] %v5591_v35  ;;  %v5594_v36 = vld [vmem:[%s5413_s5 + $0x62] sm:$0xff] }
  0x27   : > { %4517 = vmatprep.mubr.msk.f32.mxu1 %vm209_vm1, %v5443_v12  ;;  %4717 = vmatprep.mubr.msk.f32.mxu0 %vm209_vm1, %v5459_v14  ;;  %6493 = vst [vmem:[#allocation9_spill] sm:$0xff] %v5605_v37  ;;  %v5608_v38 = vld [vmem:[%s5413_s5 + $0x6a] sm:$0xff]  ;;  %v5611_v39 = vld [vmem:[%s5413_s5 + $0x121] sm:$0xff]  ;;  %v5631_v43 = vld [vmem:[%s5413_s5 + $0x139] sm:$0xff] }
  0x28   : > { %6494 = vst [vmem:[#allocation10_spill] sm:$0xff] %v5611_v39  ;;  %v5614_v40 = vld [vmem:[%s5413_s5 + $0x7a] sm:$0xff]  ;;  %v5625_v41 = vld [vmem:[%s5413_s5 + $0x129] sm:$0xff]  ;;  %6496 = vst [vmem:[#allocation12_spill] sm:$0xff] %v5631_v43 }
  0x29   : > { %6495 = vst [vmem:[#allocation11_spill] sm:$0xff] %v5625_v41  ;;  %v5628_v42 = vld [vmem:[%s5413_s5 + $0x82] sm:$0xff]  ;;  %v5634_v44 = vld [vmem:[%s5413_s5 + $0x92] sm:$0xff]  ;;  %v5648_v46 = vld [vmem:[%s5413_s5 + $0x9a] sm:$0xff] }
  0x2a   : > { %4518 = vmatmul.mubr.msk.f32.gmra.mrb[6].mxu1 %vm209_vm1, %v5456_v13  ;;  %4718 = vmatmul.mubr.msk.f32.gmra.mrb[6].mxu0 %vm209_vm1, %v5470_v15  ;;  %v5645_v45 = vld [vmem:[%s5413_s5 + $0x141] sm:$0xff]  ;;  %v5651_v47 = vld [vmem:[%s5413_s5 + $0x151] sm:$0xff]  ;;  %v5665_v49 = vld [vmem:[%s5413_s5 + $0x159] sm:$0xff] }
  0x2b   : > { %4520 = vmatprep.mubr.msk.f32.mxu1 %vm209_vm1, %v5459_v14  ;;  %4720 = vmatprep.mubr.msk.f32.mxu0 %vm209_vm1, %v5473_v16  ;;  %6497 = vst [vmem:[#allocation13_spill] sm:$0xff] %v5645_v45  ;;  %6498 = vst [vmem:[#allocation14_spill] sm:$0xff] %v5651_v47  ;;  %v5654_v48 = vld [vmem:[%s5413_s5 + $0xaa] sm:$0xff]  ;;  %v5668_v50 = vld [vmem:[%s5413_s5 + $0xb2] sm:$0xff] }
  0x2c   : > { %6499 = vst [vmem:[#allocation15_spill] sm:$0xff] %v5665_v49  ;;  %v5671_v51 = vld [vmem:[%s5413_s5 + $0x169] sm:$0xff]  ;;  %v5685_v53 = vld [vmem:[%s5413_s5 + $0x171] sm:$0xff]  ;;  %v142_v55 = vld [vmem:[%s5413_s5] sm:$0xff] }
  0x2d   : > { %6500 = vst [vmem:[#allocation16_spill] sm:$0xff] %v5671_v51  ;;  %v5674_v52 = vld [vmem:[%s5413_s5 + $0xc2] sm:$0xff]  ;;  %6501 = vst [vmem:[#allocation17_spill] sm:$0xff] %v5685_v53  ;;  %v5688_v54 = vld [vmem:[%s5413_s5 + $0xca] sm:$0xff] }
  0x2e   : > { %4521 = vmatmul.mubr.msk.f32.gmra.mrb[8].mxu1 %vm209_vm1, %v5470_v15  ;;  %4721 = vmatmul.mubr.msk.f32.gmra.mrb[8].mxu0 %vm209_vm1, %v5484_v17  ;;  %v5692_v56 = vld [vmem:[%s5413_s5 + $0xda] sm:$0xff]  ;;  %v143_v57 = vld [vmem:[%s5413_s5 + $0x8] sm:$0xff]  ;;  %v5709_v60 = vld [vmem:[%s5413_s5 + $0xf2] sm:$0xff] }
  0x2f   : > { %4523 = vmatprep.mubr.msk.f32.mxu1 %vm209_vm1, %v5473_v16  ;;  %4723 = vmatprep.mubr.msk.f32.mxu0 %vm209_vm1, %v5487_v18  ;;  %v5703_v58 = vld [vmem:[%s5413_s5 + $0xe2] sm:$0xff]  ;;  %v5706_v59 = vld [vmem:[%s5413_s5 + $0x18] sm:$0xff]  ;;  %v5732_v0 = vld [vmem:[%s5413_s5 + $0x30] sm:$0xff] }
  0x30   : > { %6502 = vst [vmem:[#allocation18_spill] sm:$0xff] %v5706_v59  ;;  %v5724_v62 = vld [vmem:[%s5413_s5 + $0x20] sm:$0xff]  ;;  %6504 = vst [vmem:[#allocation20_spill] sm:$0xff] %v5732_v0  ;;  %v5735_v2 = vld [vmem:[%s5413_s5 + $0x10a] sm:$0xff] }
  0x31   : > { %6503 = vst [vmem:[#allocation19_spill] sm:$0xff] %v5724_v62  ;;  %v5727_v63 = vld [vmem:[%s5413_s5 + $0xfa] sm:$0xff]  ;;  %v5751_v4 = vld [vmem:[%s5413_s5 + $0x112] sm:$0xff]  ;;  %v5754_v5 = vld [vmem:[%s5413_s5 + $0x48] sm:$0xff] }
  0x32   : > { %4524 = vmatmul.mubr.msk.f32.gmra.mrb[10].mxu1 %vm209_vm1, %v5484_v17  ;;  %4724 = vmatmul.mubr.msk.f32.gmra.mrb[10].mxu0 %vm209_vm1, %v5498_v19  ;;  %v5748_v3 = vld [vmem:[%s5413_s5 + $0x38] sm:$0xff]  ;;  %6506 = vst [vmem:[#allocation22_spill] sm:$0xff] %v5754_v5  ;;  %v5757_v6 = vld [vmem:[%s5413_s5 + $0x122] sm:$0xff]  ;;  %v5768_v7 = vld [vmem:[%s5413_s5 + $0x50] sm:$0xff] }
  0x33   : > { %4526 = vmatprep.mubr.msk.f32.mxu1 %vm209_vm1, %v5487_v18  ;;  %4726 = vmatprep.mubr.msk.f32.mxu0 %vm209_vm1, %v5501_v20  ;;  %6505 = vst [vmem:[#allocation21_spill] sm:$0xff] %v5748_v3  ;;  %6507 = vst [vmem:[#allocation23_spill] sm:$0xff] %v5768_v7 }
  0x36   : > { %4527 = vmatmul.mubr.msk.f32.gmra.mrb[12].mxu1 %vm209_vm1, %v5498_v19  ;;  %4727 = vmatmul.mubr.msk.f32.gmra.mrb[12].mxu0 %vm209_vm1, %v5512_v21 }
  0x37   : > { %4529 = vmatprep.mubr.msk.f32.mxu1 %vm209_vm1, %v5501_v20  ;;  %4729 = vmatprep.mubr.msk.f32.mxu0 %vm209_vm1, %v5515_v22 }
  0x3a   : > { %4530 = vmatmul.mubr.msk.f32.gmra.mrb[14].mxu1 %vm209_vm1, %v5512_v21  ;;  %4730 = vmatmul.mubr.msk.f32.gmra.mrb[14].mxu0 %vm209_vm1, %v5526_v23 }
  0x3b   : > { %4532 = vmatprep.mubr.msk.f32.mxu1 %vm209_vm1, %v5515_v22  ;;  %4758 = vmatprep.mubr.msk.f32.mxu0 %vm209_vm1, %v5529_v24 }
  0x3e   : > { %4533 = vmatmul.mubr.msk.f32.gmra.mrb[16].mxu1 %vm209_vm1, %v5526_v23  ;;  %4759 = vmatmul.mubr.msk.f32.vlgmr.msra.gmra.mrb[0].mxu0 %vm209_vm1, %v5540_v25 }
  0x3f   : > { %4807 = vmatpush3.msk.msra.mxu0 %vm306_vm0, %v4037_v9  ;;  %4535 = vmatprep.mubr.msk.f32.mxu1 %vm209_vm1, %v5543_v26  ;;  %v5771_v9 = vld [vmem:[%s5413_s5 + $0x12a] sm:$0xff] }
  0x40   : > { %4761 = vmatprep.mubr.msk.f32.mxu0 %vm209_vm1, %v5546_v27  ;;  %4856 = vmatprep.subr.msk.mxu0 %vm306_vm0, %v5551_v28 }
  0x42   : > { %4536 = vmatmul.mubr.msk.f32.gmra.mrb[18].mxu1 %vm209_vm1, %v5561_v29  ;;  %4762 = vmatmul.mubr.msk.f32.gmra.mrb[2].mxu0 %vm209_vm1, %v5564_v30  ;;  %v5868_v29 = vld [vmem:[%s5413_s5 + $0xd8] sm:$0xff] }
  0x43   : > { %4538 = vmatprep.mubr.msk.f32.mxu1 %vm209_vm1, %v5569_v31  ;;  %4764 = vmatprep.mubr.msk.f32.mxu0 %vm209_vm1, %v5572_v32  ;;  %v5851_v31 = vld [vmem:[%s5413_s5 + $0x18a] sm:$0xff] }
  0x44   : > { %6518 = vst [vmem:[#allocation34_spill] sm:$0xff] %v5851_v31 }
  0x46   : > { %4539 = vmatmul.mubr.msk.f32.gmra.mrb[20].mxu1 %vm209_vm1, %v5585_v33  ;;  %4765 = vmatmul.mubr.msk.f32.gmra.mrb[4].mxu0 %vm209_vm1, %v5588_v34  ;;  %v5837_v33 = vld [vmem:[%s5413_s5 + $0x182] sm:$0xff] }
  0x47   : > { %4541 = vmatprep.mubr.msk.f32.mxu1 %vm209_vm1, %v5591_v35  ;;  %4767 = vmatprep.mubr.msk.f32.mxu0 %vm209_vm1, %v5594_v36  ;;  %v5834_v35 = vld [vmem:[%s5413_s5 + $0xa8] sm:$0xff]  ;;  %6516 = vst [vmem:[#allocation32_spill] sm:$0xff] %v5837_v33 }
  0x48   : > { %6515 = vst [vmem:[#allocation31_spill] sm:$0xff] %v5834_v35 }
  0x4a   : > { %4542 = vmatmul.mubr.msk.f32.gmra.mrb[22].mxu1 %vm209_vm1, %v5605_v37  ;;  %4768 = vmatmul.mubr.msk.f32.gmra.mrb[6].mxu0 %vm209_vm1, %v5608_v38  ;;  %v5831_v37 = vld [vmem:[%s5413_s5 + $0x172] sm:$0xff] }
  0x4b   : > { %4544 = vmatprep.mubr.msk.f32.mxu1 %vm209_vm1, %v5611_v39  ;;  %4770 = vmatprep.mubr.msk.f32.mxu0 %vm209_vm1, %v5614_v40  ;;  %v5828_v39 = vld [vmem:[%s5413_s5 + $0x98] sm:$0xff]  ;;  %6514 = vst [vmem:[#allocation30_spill] sm:$0xff] %v5831_v37 }
  0x4c   : > { %6513 = vst [vmem:[#allocation29_spill] sm:$0xff] %v5828_v39 }
  0x4e   : > { %4545 = vmatmul.mubr.msk.f32.gmra.mrb[24].mxu1 %vm209_vm1, %v5625_v41  ;;  %4771 = vmatmul.mubr.msk.f32.gmra.mrb[8].mxu0 %vm209_vm1, %v5628_v42  ;;  %v5817_v41 = vld [vmem:[%s5413_s5 + $0x16a] sm:$0xff] }
  0x4f   : > { %4547 = vmatprep.mubr.msk.f32.mxu1 %vm209_vm1, %v5631_v43  ;;  %4773 = vmatprep.mubr.msk.f32.mxu0 %vm209_vm1, %v5634_v44  ;;  %v5814_v43 = vld [vmem:[%s5413_s5 + $0x90] sm:$0xff] }
  0x50   : > { %6512 = vst [vmem:[#allocation28_spill] sm:$0xff] %v5814_v43 }
  0x52   : > { %4548 = vmatmul.mubr.msk.f32.gmra.mrb[26].mxu1 %vm209_vm1, %v5645_v45  ;;  %4774 = vmatmul.mubr.msk.f32.gmra.mrb[10].mxu0 %vm209_vm1, %v5648_v46  ;;  %v5811_v45 = vld [vmem:[%s5413_s5 + $0x15a] sm:$0xff] }
  0x53   : > { %4550 = vmatprep.mubr.msk.f32.mxu1 %vm209_vm1, %v5651_v47  ;;  %4776 = vmatprep.mubr.msk.f32.mxu0 %vm209_vm1, %v5654_v48  ;;  %v5808_v47 = vld [vmem:[%s5413_s5 + $0x80] sm:$0xff] }
  0x54   : > { %6511 = vst [vmem:[#allocation27_spill] sm:$0xff] %v5808_v47 }
  0x56   : > { %4551 = vmatmul.mubr.msk.f32.gmra.mrb[28].mxu1 %vm209_vm1, %v5665_v49  ;;  %4777 = vmatmul.mubr.msk.f32.gmra.mrb[12].mxu0 %vm209_vm1, %v5668_v50  ;;  %v5797_v49 = vld [vmem:[%s5413_s5 + $0x152] sm:$0xff] }
  0x57   : > { %4553 = vmatprep.mubr.msk.f32.mxu1 %vm209_vm1, %v5671_v51  ;;  %4779 = vmatprep.mubr.msk.f32.mxu0 %vm209_vm1, %v5674_v52  ;;  %v5794_v51 = vld [vmem:[%s5413_s5 + $0x78] sm:$0xff] }
  0x58   : > { %6510 = vst [vmem:[#allocation26_spill] sm:$0xff] %v5794_v51 }
  0x5a   : > { %4554 = vmatmul.mubr.msk.f32.gmra.mrb[30].mxu1 %vm209_vm1, %v5685_v53  ;;  %4780 = vmatmul.mubr.msk.f32.gmra.mrb[14].mxu0 %vm209_vm1, %v5688_v54  ;;  %v5791_v53 = vld [vmem:[%s5413_s5 + $0x142] sm:$0xff] }
  0x5b   : > { %4558 = vmatprep.mubr.msk.f32.mxu1 %vm209_vm1, %v142_v55  ;;  %4782 = vmatprep.mubr.msk.f32.mxu0 %vm209_vm1, %v5692_v56  ;;  %v5777_v55 = vld [vmem:[%s5413_s5 + $0x13a] sm:$0xff] }
  0x5e   : > { %4559 = vmatmul.mubr.msk.f32.vlgmr.msra.gmra.mrb[0].mxu1 %vm209_vm1, %v143_v57  ;;  %4783 = vmatmul.mubr.msk.f32.gmra.mrb[16].mxu0 %vm209_vm1, %v5703_v58  ;;  %v5788_v57 = vld [vmem:[%s5413_s5 + $0x68] sm:$0xff] }
  0x5f   : > { %4607 = vmatpush3.msk.msra.mxu1 %vm306_vm0, %v5432_v10  ;;  %4561 = vmatprep.mubr.msk.f32.mxu1 %vm209_vm1, %v5706_v59  ;;  %v5774_v10 = vld [vmem:[%s5413_s5 + $0x60] sm:$0xff]  ;;  %6509 = vst [vmem:[#allocation25_spill] sm:$0xff] %v5788_v57 }
  0x60   : > { %4785 = vmatprep.mubr.msk.f32.mxu0 %vm209_vm1, %v5709_v60  ;;  %4656 = vmatprep.subr.msk.mxu1 %vm306_vm0, %v5714_v61  ;;  %6508 = vst [vmem:[#allocation24_spill] sm:$0xff] %v5774_v10  ;;  %v5854_v59 = vld [vmem:[%s5413_s5 + $0xc0] sm:$0xff] }
  0x62   : > { %4562 = vmatmul.mubr.msk.f32.gmra.mrb[2].mxu1 %vm209_vm1, %v5724_v62  ;;  %4786 = vmatmul.mubr.msk.f32.gmra.mrb[18].mxu0 %vm209_vm1, %v5727_v63  ;;  %v5848_v62 = vld [vmem:[%s5413_s5 + $0xb0] sm:$0xff] }
  0x63   : > { %4564 = vmatprep.mubr.msk.f32.mxu1 %vm209_vm1, %v5732_v0  ;;  %4788 = vmatprep.mubr.msk.f32.mxu0 %vm209_vm1, %v5735_v2  ;;  %6517 = vst [vmem:[#allocation33_spill] sm:$0xff] %v5848_v62 }
  0x66   : > { %4565 = vmatmul.mubr.msk.f32.gmra.mrb[4].mxu1 %vm209_vm1, %v5748_v3  ;;  %4789 = vmatmul.mubr.msk.f32.gmra.mrb[20].mxu0 %vm209_vm1, %v5751_v4 }
  0x67   : > { %4567 = vmatprep.mubr.msk.f32.mxu1 %vm209_vm1, %v5754_v5  ;;  %4791 = vmatprep.mubr.msk.f32.mxu0 %vm209_vm1, %v5757_v6 }
  0x6a   : > { %4568 = vmatmul.mubr.msk.f32.gmra.mrb[6].mxu1 %vm209_vm1, %v5768_v7  ;;  %4792 = vmatmul.mubr.msk.f32.gmra.mrb[22].mxu0 %vm209_vm1, %v5771_v9 }
  0x6b   : > { %4570 = vmatprep.mubr.msk.f32.mxu1 %vm209_vm1, %v5774_v10  ;;  %4794 = vmatprep.mubr.msk.f32.mxu0 %vm209_vm1, %v5777_v55 }
  0x6e   : > { %4571 = vmatmul.mubr.msk.f32.gmra.mrb[8].mxu1 %vm209_vm1, %v5788_v57  ;;  %4795 = vmatmul.mubr.msk.f32.gmra.mrb[24].mxu0 %vm209_vm1, %v5791_v53 }
  0x6f   : > { %4573 = vmatprep.mubr.msk.f32.mxu1 %vm209_vm1, %v5794_v51  ;;  %4797 = vmatprep.mubr.msk.f32.mxu0 %vm209_vm1, %v5797_v49 }
  0x72   : > { %4574 = vmatmul.mubr.msk.f32.gmra.mrb[10].mxu1 %vm209_vm1, %v5808_v47  ;;  %4798 = vmatmul.mubr.msk.f32.gmra.mrb[26].mxu0 %vm209_vm1, %v5811_v45 }
  0x73   : > { %4576 = vmatprep.mubr.msk.f32.mxu1 %vm209_vm1, %v5814_v43  ;;  %4800 = vmatprep.mubr.msk.f32.mxu0 %vm209_vm1, %v5817_v41 }
  0x76   : > { %4577 = vmatmul.mubr.msk.f32.gmra.mrb[12].mxu1 %vm209_vm1, %v5828_v39  ;;  %4801 = vmatmul.mubr.msk.f32.gmra.mrb[28].mxu0 %vm209_vm1, %v5831_v37  ;;  %v5873_v37 = vld [vmem:[%s6440_s1 + $0x20] sm:$0x7] }
  0x77   : > { %4579 = vmatprep.mubr.msk.f32.mxu1 %vm209_vm1, %v5834_v35  ;;  %4803 = vmatprep.mubr.msk.f32.mxu0 %vm209_vm1, %v5837_v33  ;;  %v5865_v33 = vld [vmem:[%s5413_s5 + $0xc8] sm:$0xff] }
  0x78   : > { %6519 = vst [vmem:[#allocation35_spill] sm:$0xff] %v5865_v33 }
  0x7a   : > { %4580 = vmatmul.mubr.msk.f32.gmra.mrb[14].mxu1 %vm209_vm1, %v5848_v62  ;;  %4804 = vmatmul.mubr.msk.f32.gmra.mrb[30].mxu0 %vm209_vm1, %v5851_v31  ;;  %v5884_v31 = vld [vmem:[%s5413_s5 + $0xe0] sm:$0xff] }
  0x7b   : > { %4582 = vmatprep.mubr.msk.f32.mxu1 %vm209_vm1, %v5854_v59  ;;  %4808 = vmatprep.mubr.msk.f32.mxu0 %vm209_vm1, %v5732_v0  ;;  %v5889_v0 = vld [vmem:[%s5413_s5 + $0xf0] sm:$0xff] }
  0x7e   : > { %4583 = vmatmul.mubr.msk.f32.gmra.mrb[16].mxu1 %vm209_vm1, %v5865_v33  ;;  %4809 = vmatmul.mubr.msk.f32.vlgmr.msra.gmra.mrb[0].mxu0 %vm209_vm1, %v5748_v3  ;;  %v859_v3 = vld [vmem:[%s5413_s5 + $0x2] sm:$0xff] }
  0x7f   : > { %4857 = vmatpush3.msk.msra.mxu0 %vm306_vm0, %v5551_v28  ;;  %4585 = vmatprep.mubr.msk.f32.mxu1 %vm209_vm1, %v5868_v29  ;;  %v5902_v28 = vld [vmem:[%s5413_s5 + $0xf8] sm:$0xff] }
  0x80   : > { %4811 = vmatprep.mubr.msk.f32.mxu0 %vm209_vm1, %v5754_v5  ;;  %4906 = vmatprep.subr.msk.mxu0 %vm306_vm0, %v5873_v37  ;;  %v5905_v5 = vld [vmem:[%s5413_s5 + $0x108] sm:$0xff] }
  0x82   : > { %4586 = vmatmul.mubr.msk.f32.gmra.mrb[18].mxu1 %vm209_vm1, %v5884_v31  ;;  %4812 = vmatmul.mubr.msk.f32.gmra.mrb[2].mxu0 %vm209_vm1, %v5768_v7  ;;  %v5916_v7 = vld [vmem:[%s5413_s5 + $0x110] sm:$0xff] }
  0x83   : > { %4588 = vmatprep.mubr.msk.f32.mxu1 %vm209_vm1, %v5889_v0  ;;  %4814 = vmatprep.mubr.msk.f32.mxu0 %vm209_vm1, %v5774_v10  ;;  %v5919_v10 = vld [vmem:[%s5413_s5 + $0x120] sm:$0xff] }
  0x86   : > { %4589 = vmatmul.mubr.msk.f32.gmra.mrb[20].mxu1 %vm209_vm1, %v5902_v28  ;;  %4815 = vmatmul.mubr.msk.f32.gmra.mrb[4].mxu0 %vm209_vm1, %v5788_v57  ;;  %v5930_v57 = vld [vmem:[%s5413_s5 + $0x128] sm:$0xff] }
  0x87   : > { %4591 = vmatprep.mubr.msk.f32.mxu1 %vm209_vm1, %v5905_v5  ;;  %4817 = vmatprep.mubr.msk.f32.mxu0 %vm209_vm1, %v5794_v51  ;;  %v5933_v51 = vld [vmem:[%s5413_s5 + $0x138] sm:$0xff] }
  0x8a   : > { %4592 = vmatmul.mubr.msk.f32.gmra.mrb[22].mxu1 %vm209_vm1, %v5916_v7  ;;  %4818 = vmatmul.mubr.msk.f32.gmra.mrb[6].mxu0 %vm209_vm1, %v5808_v47  ;;  %v5944_v47 = vld [vmem:[%s5413_s5 + $0x140] sm:$0xff] }
  0x8b   : > { %4594 = vmatprep.mubr.msk.f32.mxu1 %vm209_vm1, %v5919_v10  ;;  %4820 = vmatprep.mubr.msk.f32.mxu0 %vm209_vm1, %v5814_v43  ;;  %v5947_v43 = vld [vmem:[%s5413_s5 + $0x150] sm:$0xff] }
  0x8e   : > { %4595 = vmatmul.mubr.msk.f32.gmra.mrb[24].mxu1 %vm209_vm1, %v5930_v57  ;;  %4821 = vmatmul.mubr.msk.f32.gmra.mrb[8].mxu0 %vm209_vm1, %v5828_v39  ;;  %v5958_v39 = vld [vmem:[%s5413_s5 + $0x158] sm:$0xff] }
  0x8f   : > { %4597 = vmatprep.mubr.msk.f32.mxu1 %vm209_vm1, %v5933_v51  ;;  %4823 = vmatprep.mubr.msk.f32.mxu0 %vm209_vm1, %v5834_v35  ;;  %v5961_v35 = vld [vmem:[%s5413_s5 + $0x168] sm:$0xff] }
  0x92   : > { %4598 = vmatmul.mubr.msk.f32.gmra.mrb[26].mxu1 %vm209_vm1, %v5944_v47  ;;  %4824 = vmatmul.mubr.msk.f32.gmra.mrb[10].mxu0 %vm209_vm1, %v5848_v62  ;;  %v5972_v62 = vld [vmem:[%s5413_s5 + $0x170] sm:$0xff] }
  0x93   : > { %4600 = vmatprep.mubr.msk.f32.mxu1 %vm209_vm1, %v5947_v43  ;;  %4826 = vmatprep.mubr.msk.f32.mxu0 %vm209_vm1, %v5854_v59 }
  0x96   : > { %4601 = vmatmul.mubr.msk.f32.gmra.mrb[28].mxu1 %vm209_vm1, %v5958_v39  ;;  %4827 = vmatmul.mubr.msk.f32.gmra.mrb[12].mxu0 %vm209_vm1, %v5865_v33  ;;  %v860_v33 = vld [vmem:[%s5413_s5 + $0xa] sm:$0xff] }
  0x97   : > { %4603 = vmatprep.mubr.msk.f32.mxu1 %vm209_vm1, %v5961_v35  ;;  %4829 = vmatprep.mubr.msk.f32.mxu0 %vm209_vm1, %v5868_v29 }
  0x9a   : > { %4604 = vmatmul.mubr.msk.f32.gmra.mrb[30].mxu1 %vm209_vm1, %v5972_v62  ;;  %4830 = vmatmul.mubr.msk.f32.gmra.mrb[14].mxu0 %vm209_vm1, %v5884_v31 }
  0x9b   : > { %4608 = vmatprep.mubr.msk.f32.mxu1 %vm209_vm1, %v859_v3  ;;  %4832 = vmatprep.mubr.msk.f32.mxu0 %vm209_vm1, %v5889_v0  ;;  %v6536_v3 = vld [vmem:[#allocation25_spill] sm:$0xff] }
  0x9e   : > { %4609 = vmatmul.mubr.msk.f32.vlgmr.msra.gmra.mrb[0].mxu1 %vm209_vm1, %v860_v33  ;;  %4833 = vmatmul.mubr.msk.f32.gmra.mrb[16].mxu0 %vm209_vm1, %v5902_v28  ;;  %v4035_v33 = vld [vmem:[%s5413_s5 + $0x198] sm:$0xff] }
  0x9f   : > { %4657 = vmatpush3.msk.msra.mxu1 %vm306_vm0, %v5714_v61  ;;  %4611 = vmatprep.mubr.msk.f32.mxu1 %vm209_vm1, %v5529_v24  ;;  %v6027_v24 = vld [vmem:[%s5413_s5 + $0x180] sm:$0xff] }
  0xa0   : > { %4835 = vmatprep.mubr.msk.f32.mxu0 %vm209_vm1, %v5905_v5  ;;  %4956 = vmatprep.subr.msk.mxu1 %vm306_vm0, %v5392_v1  ;;  %v4036_v61 = vld [vmem:[%s5413_s5 + $0x1a0] sm:$0xff] }
  0xa2   : > { %4612 = vmatmul.mubr.msk.f32.gmra.mrb[2].mxu1 %vm209_vm1, %v5540_v25  ;;  %4836 = vmatmul.mubr.msk.f32.gmra.mrb[18].mxu0 %vm209_vm1, %v5916_v7  ;;  %v6038_v25 = vld [vmem:[%s5413_s5 + $0x188] sm:$0xff] }
  0xa3   : > { %4614 = vmatprep.mubr.msk.f32.mxu1 %vm209_vm1, %v5546_v27  ;;  %4838 = vmatprep.mubr.msk.f32.mxu0 %vm209_vm1, %v5919_v10 }
  0xa6   : > { %4615 = vmatmul.mubr.msk.f32.gmra.mrb[4].mxu1 %vm209_vm1, %v5564_v30  ;;  %4839 = vmatmul.mubr.msk.f32.gmra.mrb[20].mxu0 %vm209_vm1, %v5930_v57 }
  0xa7   : > { %4617 = vmatprep.mubr.msk.f32.mxu1 %vm209_vm1, %v5572_v32  ;;  %4841 = vmatprep.mubr.msk.f32.mxu0 %vm209_vm1, %v5933_v51 }
  0xaa   : > { %4618 = vmatmul.mubr.msk.f32.gmra.mrb[6].mxu1 %vm209_vm1, %v5588_v34  ;;  %4842 = vmatmul.mubr.msk.f32.gmra.mrb[22].mxu0 %vm209_vm1, %v5944_v47 }
  0xab   : > { %4620 = vmatprep.mubr.msk.f32.mxu1 %vm209_vm1, %v5594_v36  ;;  %4844 = vmatprep.mubr.msk.f32.mxu0 %vm209_vm1, %v5947_v43 }
  0xae   : > { %4621 = vmatmul.mubr.msk.f32.gmra.mrb[8].mxu1 %vm209_vm1, %v5608_v38  ;;  %4845 = vmatmul.mubr.msk.f32.gmra.mrb[24].mxu0 %vm209_vm1, %v5958_v39 }
  0xaf   : > { %4623 = vmatprep.mubr.msk.f32.mxu1 %vm209_vm1, %v5614_v40  ;;  %4847 = vmatprep.mubr.msk.f32.mxu0 %vm209_vm1, %v5961_v35 }
  0xb2   : > { %4624 = vmatmul.mubr.msk.f32.gmra.mrb[10].mxu1 %vm209_vm1, %v5628_v42  ;;  %4848 = vmatmul.mubr.msk.f32.gmra.mrb[26].mxu0 %vm209_vm1, %v5972_v62 }
  0xb3   : > { %4626 = vmatprep.mubr.msk.f32.mxu1 %vm209_vm1, %v5634_v44  ;;  %4850 = vmatprep.mubr.msk.f32.mxu0 %vm209_vm1, %v6027_v24 }
  0xb6   : > { %4627 = vmatmul.mubr.msk.f32.gmra.mrb[12].mxu1 %vm209_vm1, %v5648_v46  ;;  %4851 = vmatmul.mubr.msk.f32.gmra.mrb[28].mxu0 %vm209_vm1, %v6038_v25 }
  0xb7   : > { %4629 = vmatprep.mubr.msk.f32.mxu1 %vm209_vm1, %v5654_v48  ;;  %4853 = vmatprep.mubr.msk.f32.mxu0 %vm209_vm1, %v4035_v33  ;;  %v6537_v33 = vld [vmem:[#allocation13_spill] sm:$0xff] }
  0xba   : > { %4630 = vmatmul.mubr.msk.f32.gmra.mrb[14].mxu1 %vm209_vm1, %v5668_v50  ;;  %4854 = vmatmul.mubr.msk.f32.gmra.mrb[30].mxu0 %vm209_vm1, %v4036_v61  ;;  %v6538_v61 = vld [vmem:[#allocation26_spill] sm:$0xff] }
  0xbb   : > { %4632 = vmatprep.mubr.msk.f32.mxu1 %vm209_vm1, %v5674_v52  ;;  %4858 = vmatprep.mubr.msk.f32.mxu0 %vm209_vm1, %v5422_v8  ;;  %v6520_v8 = vld [vmem:[#allocation30_spill] sm:$0xff] }
  0xbe   : > { %4633 = vmatmul.mubr.msk.f32.gmra.mrb[16].mxu1 %vm209_vm1, %v5688_v54  ;;  %4859 = vmatmul.mubr.msk.f32.vlgmr.msra.gmra.mrb[0].mxu0 %vm209_vm1, %v5437_v11  ;;  %v6521_v11 = vld [vmem:[#allocation5_spill] sm:$0xff] }
  0xbf   : > { %4907 = vmatpush3.msk.msra.mxu0 %vm306_vm0, %v5873_v37  ;;  %4635 = vmatprep.mubr.msk.f32.mxu1 %vm209_vm1, %v5692_v56  ;;  %v6535_v37 = vld [vmem:[#allocation12_spill] sm:$0xff] }
  0xc0   : > { %4861 = vmatprep.mubr.msk.f32.mxu0 %vm209_vm1, %v5443_v12  ;;  %v6522_v12 = vld [vmem:[#allocation18_spill] sm:$0xff] }
  0xc2   : > { %4636 = vmatmul.mubr.msk.f32.gmra.mrb[18].mxu1 %vm209_vm1, %v5703_v58  ;;  %4862 = vmatmul.mubr.msk.f32.gmra.mrb[2].mxu0 %vm209_vm1, %v5456_v13  ;;  %v6523_v13 = vld [vmem:[#allocation6_spill] sm:$0xff] }
  0xc3   : > { %4638 = vmatprep.mubr.msk.f32.mxu1 %vm209_vm1, %v5709_v60  ;;  %4864 = vmatprep.mubr.msk.f32.mxu0 %vm209_vm1, %v5459_v14  ;;  %v6524_v14 = vld [vmem:[#allocation19_spill] sm:$0xff] }
  0xc6   : > { %4639 = vmatmul.mubr.msk.f32.gmra.mrb[20].mxu1 %vm209_vm1, %v5727_v63  ;;  %4865 = vmatmul.mubr.msk.f32.gmra.mrb[4].mxu0 %vm209_vm1, %v5470_v15  ;;  %v6525_v15 = vld [vmem:[#allocation7_spill] sm:$0xff] }
  0xc7   : > { %4641 = vmatprep.mubr.msk.f32.mxu1 %vm209_vm1, %v5735_v2  ;;  %4867 = vmatprep.mubr.msk.f32.mxu0 %vm209_vm1, %v5473_v16  ;;  %v6526_v16 = vld [vmem:[#allocation20_spill] sm:$0xff] }
  0xca   : > { %4642 = vmatmul.mubr.msk.f32.gmra.mrb[22].mxu1 %vm209_vm1, %v5751_v4  ;;  %4868 = vmatmul.mubr.msk.f32.gmra.mrb[6].mxu0 %vm209_vm1, %v5484_v17  ;;  %v6527_v17 = vld [vmem:[#allocation8_spill] sm:$0xff] }
  0xcb   : > { %4644 = vmatprep.mubr.msk.f32.mxu1 %vm209_vm1, %v5757_v6  ;;  %4870 = vmatprep.mubr.msk.f32.mxu0 %vm209_vm1, %v5487_v18  ;;  %v6528_v18 = vld [vmem:[#allocation21_spill] sm:$0xff] }
  0xce   : > { %4645 = vmatmul.mubr.msk.f32.gmra.mrb[24].mxu1 %vm209_vm1, %v5771_v9  ;;  %4871 = vmatmul.mubr.msk.f32.gmra.mrb[8].mxu0 %vm209_vm1, %v5498_v19  ;;  %v6529_v19 = vld [vmem:[#allocation9_spill] sm:$0xff] }
  0xcf   : > { %4647 = vmatprep.mubr.msk.f32.mxu1 %vm209_vm1, %v5777_v55  ;;  %4873 = vmatprep.mubr.msk.f32.mxu0 %vm209_vm1, %v5501_v20  ;;  %v6530_v20 = vld [vmem:[#allocation22_spill] sm:$0xff] }
  0xd2   : > { %4648 = vmatmul.mubr.msk.f32.gmra.mrb[26].mxu1 %vm209_vm1, %v5791_v53  ;;  %4874 = vmatmul.mubr.msk.f32.gmra.mrb[10].mxu0 %vm209_vm1, %v5512_v21  ;;  %v6531_v21 = vld [vmem:[#allocation10_spill] sm:$0xff] }
  0xd3   : > { %4650 = vmatprep.mubr.msk.f32.mxu1 %vm209_vm1, %v5797_v49  ;;  %4876 = vmatprep.mubr.msk.f32.mxu0 %vm209_vm1, %v5515_v22  ;;  %v6533_v22 = vld [vmem:[#allocation11_spill] sm:$0xff] }
  0xd6   : > { %4651 = vmatmul.mubr.msk.f32.gmra.mrb[28].mxu1 %vm209_vm1, %v5811_v45  ;;  %4877 = vmatmul.mubr.msk.f32.gmra.mrb[12].mxu0 %vm209_vm1, %v5526_v23  ;;  %v6534_v23 = vld [vmem:[#allocation24_spill] sm:$0xff] }
  0xd7   : > { %4653 = vmatprep.mubr.msk.f32.mxu1 %vm209_vm1, %v5817_v41  ;;  %4879 = vmatprep.mubr.msk.f32.mxu0 %vm209_vm1, %v5543_v26 }
  0xda   : > { %4654 = vmatmul.mubr.msk.f32.gmra.mrb[30].mxu1 %vm209_vm1, %v6520_v8  ;;  %4880 = vmatmul.mubr.msk.f32.gmra.mrb[14].mxu0 %vm209_vm1, %v6521_v11  ;;  %v6547_v8 = vld [vmem:[#allocation33_spill] sm:$0xff] }
  0xdb   : > { %4658 = vmatprep.mubr.msk.f32.mxu1 %vm209_vm1, %v6522_v12  ;;  %4882 = vmatprep.mubr.msk.f32.mxu0 %vm209_vm1, %v6523_v13  ;;  %v6539_v12 = vld [vmem:[#allocation14_spill] sm:$0xff] }
  0xde   : > { %4659 = vmatmul.mubr.msk.f32.vlgmr.msra.gmra.mrb[0].mxu1 %vm209_vm1, %v6524_v14  ;;  %4883 = vmatmul.mubr.msk.f32.gmra.mrb[16].mxu0 %vm209_vm1, %v6525_v15  ;;  %v6540_v14 = vld [vmem:[#allocation27_spill] sm:$0xff] }
  0xdf   : > { %4957 = vmatpush3.msk.msra.mxu1 %vm306_vm0, %v5392_v1  ;;  %4661 = vmatprep.mubr.msk.f32.mxu1 %vm209_vm1, %v6526_v16  ;;  %v6532_v1 = vld [vmem:[#allocation23_spill] sm:$0xff] }
  0xe0   : > { %4885 = vmatprep.mubr.msk.f32.mxu0 %vm209_vm1, %v6527_v17  ;;  %v6541_v16 = vld [vmem:[#allocation15_spill] sm:$0xff] }
  0xe2   : > { %4662 = vmatmul.mubr.msk.f32.gmra.mrb[2].mxu1 %vm209_vm1, %v6528_v18  ;;  %4886 = vmatmul.mubr.msk.f32.gmra.mrb[18].mxu0 %vm209_vm1, %v6529_v19  ;;  %v6542_v18 = vld [vmem:[#allocation28_spill] sm:$0xff] }
  0xe3   : > { %4664 = vmatprep.mubr.msk.f32.mxu1 %vm209_vm1, %v6530_v20  ;;  %4888 = vmatprep.mubr.msk.f32.mxu0 %vm209_vm1, %v6531_v21  ;;  %v6543_v20 = vld [vmem:[#allocation16_spill] sm:$0xff] }
  0xe6   : > { %4665 = vmatmul.mubr.msk.f32.gmra.mrb[4].mxu1 %vm209_vm1, %v6532_v1  ;;  %4889 = vmatmul.mubr.msk.f32.gmra.mrb[20].mxu0 %vm209_vm1, %v6533_v22  ;;  %v6165_v1 = vld [vmem:[%s5413_s5 + $0x181] sm:$0xff] }
  0xe7   : > { %4667 = vmatprep.mubr.msk.f32.mxu1 %vm209_vm1, %v6534_v23  ;;  %4891 = vmatprep.mubr.msk.f32.mxu0 %vm209_vm1, %v6535_v37  ;;  %v6544_v23 = vld [vmem:[#allocation29_spill] sm:$0xff] }
  0xea   : > { %4668 = vmatmul.mubr.msk.f32.gmra.mrb[6].mxu1 %vm209_vm1, %v6536_v3  ;;  %4892 = vmatmul.mubr.msk.f32.gmra.mrb[22].mxu0 %vm209_vm1, %v6537_v33  ;;  %v6545_v3 = vld [vmem:[#allocation17_spill] sm:$0xff] }
  0xeb   : > { %4670 = vmatprep.mubr.msk.f32.mxu1 %vm209_vm1, %v6538_v61  ;;  %4894 = vmatprep.mubr.msk.f32.mxu0 %vm209_vm1, %v6539_v12  ;;  %v6546_v61 = vld [vmem:[#allocation31_spill] sm:$0xff] }
  0xee   : > { %4671 = vmatmul.mubr.msk.f32.gmra.mrb[8].mxu1 %vm209_vm1, %v6540_v14  ;;  %4895 = vmatmul.mubr.msk.f32.gmra.mrb[24].mxu0 %vm209_vm1, %v6541_v16  ;;  %v6176_v14 = vld [vmem:[%s5413_s5 + $0x189] sm:$0xff] }
  0xef   : > { %4673 = vmatprep.mubr.msk.f32.mxu1 %vm209_vm1, %v6542_v18  ;;  %4897 = vmatprep.mubr.msk.f32.mxu0 %vm209_vm1, %v6543_v20  ;;  %v4101_v18 = vld [vmem:[%s5413_s5 + $0x199] sm:$0xff] }
  0xf2   : > { %4674 = vmatmul.mubr.msk.f32.gmra.mrb[10].mxu1 %vm209_vm1, %v6544_v23  ;;  %4898 = vmatmul.mubr.msk.f32.gmra.mrb[26].mxu0 %vm209_vm1, %v6545_v3  ;;  %v4102_v23 = vld [vmem:[%s5413_s5 + $0x1a1] sm:$0xff]  ;;  %v6548_v3 = vld [vmem:[#allocation35_spill] sm:$0xff] }
  0xf3   : > { %4676 = vmatprep.mubr.msk.f32.mxu1 %vm209_vm1, %v6546_v61  ;;  %4900 = vmatprep.mubr.msk.f32.mxu0 %vm209_vm1, %v6165_v1 }
  0xf6   : > { %4677 = vmatmul.mubr.msk.f32.gmra.mrb[12].mxu1 %vm209_vm1, %v6547_v8  ;;  %4901 = vmatmul.mubr.msk.f32.gmra.mrb[28].mxu0 %vm209_vm1, %v6176_v14 }
  0xf7   : > { %4679 = vmatprep.mubr.msk.f32.mxu1 %vm209_vm1, %v5854_v59  ;;  %4903 = vmatprep.mubr.msk.f32.mxu0 %vm209_vm1, %v4101_v18 }
  0xfa   : > { %4680 = vmatmul.mubr.msk.f32.gmra.mrb[14].mxu1 %vm209_vm1, %v6548_v3  ;;  %4904 = vmatmul.mubr.msk.f32.gmra.mrb[30].mxu0 %vm209_vm1, %v4102_v23 }
  0xfb   : > { %4682 = vmatprep.mubr.msk.f32.mxu1 %vm209_vm1, %v5868_v29  ;;  %4908 = vmatprep.mubr.msk.f32.mxu0 %vm209_vm1, %v5546_v27  ;;  %v6550_v27 = vld [vmem:[#allocation32_spill] sm:$0xff] }
  0xfc   : > { %v4167_v29 = vld [vmem:[%s5413_s5 + $0x19a] sm:$0xff] }
  0xfe   : > { %4683 = vmatmul.mubr.msk.f32.gmra.mrb[16].mxu1 %vm209_vm1, %v5884_v31  ;;  %4909 = vmatmul.mubr.msk.f32.vlgmr.msra.gmra.mrb[0].mxu0 %vm209_vm1, %v5564_v30  ;;  %v6551_v30 = vld [vmem:[#allocation17_spill] sm:$0xff]  ;;  %v6552_v31 = vld [vmem:[#allocation34_spill] sm:$0xff] }
  0xff   : > { %4685 = vmatprep.mubr.msk.f32.mxu1 %vm209_vm1, %v5889_v0  ;;  %4911 = vmatprep.mubr.msk.f32.mxu0 %vm209_vm1, %v5572_v32  ;;  %v4168_v32 = vld [vmem:[%s5413_s5 + $0x1a2] sm:$0xff]  ;;  %s5256_s5 = scalar_lea.vmem %s6390_s29, 4096 }
 0x100   : > { %p5257_p11 = scmp.ne.s32.totalorder %s6390_s29, %s5256_s5  ;;  %p5264_p1 = scmp.lt.s32.totalorder %s5262_s8, %s5256_s5 }
 0x102   : > { %4686 = vmatmul.mubr.msk.f32.gmra.mrb[18].mxu1 %vm209_vm1, %v5902_v28  ;;  %4912 = vmatmul.mubr.msk.f32.gmra.mrb[2].mxu0 %vm209_vm1, %v5588_v34  ;;  %p5258_p12 = pnand %p5257_p11, %p5376_p5  ;;  %p5265_p2 = por %p5264_p1, %p5263_p0 }
 0x103   : > { %4688 = vmatprep.mubr.msk.f32.mxu1 %vm209_vm1, %v5905_v5  ;;  %4914 = vmatprep.mubr.msk.f32.mxu0 %vm209_vm1, %v5594_v36 }
 0x104   : > { %p5259_p13 = pneg %p5258_p12 }
 0x106   : > { %4689 = vmatmul.mubr.msk.f32.gmra.mrb[20].mxu1 %vm209_vm1, %v5916_v7  ;;  %4915 = vmatmul.mubr.msk.f32.gmra.mrb[4].mxu0 %vm209_vm1, %v5608_v38  ;;  %p5266_p3 = pnand %p5265_p2, %p5259_p13 }
 0x107   : > { %4691 = vmatprep.mubr.msk.f32.mxu1 %vm209_vm1, %v5919_v10  ;;  %4917 = vmatprep.mubr.msk.f32.mxu0 %vm209_vm1, %v5614_v40 }
 0x10a   : > { %4692 = vmatmul.mubr.msk.f32.gmra.mrb[22].mxu1 %vm209_vm1, %v5930_v57  ;;  %4918 = vmatmul.mubr.msk.f32.gmra.mrb[6].mxu0 %vm209_vm1, %v5628_v42 }
 0x10b   : > { %4694 = vmatprep.mubr.msk.f32.mxu1 %vm209_vm1, %v5933_v51  ;;  %4920 = vmatprep.mubr.msk.f32.mxu0 %vm209_vm1, %v5634_v44 }
 0x10e   : > { %4695 = vmatmul.mubr.msk.f32.gmra.mrb[24].mxu1 %vm209_vm1, %v5944_v47  ;;  %4921 = vmatmul.mubr.msk.f32.gmra.mrb[8].mxu0 %vm209_vm1, %v5648_v46 }
 0x10f   : > { %4697 = vmatprep.mubr.msk.f32.mxu1 %vm209_vm1, %v5947_v43  ;;  %4923 = vmatprep.mubr.msk.f32.mxu0 %vm209_vm1, %v5654_v48 }
 0x112   : > { %4698 = vmatmul.mubr.msk.f32.gmra.mrb[26].mxu1 %vm209_vm1, %v5958_v39  ;;  %4924 = vmatmul.mubr.msk.f32.gmra.mrb[10].mxu0 %vm209_vm1, %v5668_v50 }
 0x113   : > { %4700 = vmatprep.mubr.msk.f32.mxu1 %vm209_vm1, %v5961_v35  ;;  %4926 = vmatprep.mubr.msk.f32.mxu0 %vm209_vm1, %v5674_v52 }
 0x116   : > { %4701 = vmatmul.mubr.msk.f32.gmra.mrb[28].mxu1 %vm209_vm1, %v5972_v62  ;;  %4927 = vmatmul.mubr.msk.f32.gmra.mrb[12].mxu0 %vm209_vm1, %v5688_v54 }
 0x117   : > { %4703 = vmatprep.mubr.msk.f32.mxu1 %vm209_vm1, %v6027_v24  ;;  %4929 = vmatprep.mubr.msk.f32.mxu0 %vm209_vm1, %v5692_v56 }
 0x11a   : > { %4704 = vmatmul.mubr.msk.f32.gmra.mrb[30].mxu1 %vm209_vm1, %v6038_v25  ;;  %4930 = vmatmul.mubr.msk.f32.gmra.mrb[14].mxu0 %vm209_vm1, %v5703_v58 }
 0x11b   : > { %4732 = vmatprep.mubr.msk.f32.mxu1 %vm209_vm1, %v5543_v26  ;;  %4932 = vmatprep.mubr.msk.f32.mxu0 %vm209_vm1, %v5709_v60  ;;  %v6549_v26 = vld [vmem:[#allocation30_spill] sm:$0xff] }
 0x11e   : > { %4733 = vmatmul.mubr.msk.f32.vlgmr.msra.gmra.mrb[16].mxu1 %vm209_vm1, %v6521_v11  ;;  %4933 = vmatmul.mubr.msk.f32.gmra.mrb[16].mxu0 %vm209_vm1, %v5727_v63 }
 0x11f   : > { %4735 = vmatprep.mubr.msk.f32.mxu1 %vm209_vm1, %v6523_v13  ;;  %4935 = vmatprep.mubr.msk.f32.mxu0 %vm209_vm1, %v5735_v2 }
 0x122   : > { %4736 = vmatmul.mubr.msk.f32.gmra.mrb[18].mxu1 %vm209_vm1, %v6525_v15  ;;  %4936 = vmatmul.mubr.msk.f32.gmra.mrb[18].mxu0 %vm209_vm1, %v5751_v4 }
 0x123   : > { %4738 = vmatprep.mubr.msk.f32.mxu1 %vm209_vm1, %v6527_v17  ;;  %4938 = vmatprep.mubr.msk.f32.mxu0 %vm209_vm1, %v5757_v6 }
 0x126   : > { %4739 = vmatmul.mubr.msk.f32.gmra.mrb[20].mxu1 %vm209_vm1, %v6529_v19  ;;  %4939 = vmatmul.mubr.msk.f32.gmra.mrb[20].mxu0 %vm209_vm1, %v5771_v9 }
 0x127   : > { %4741 = vmatprep.mubr.msk.f32.mxu1 %vm209_vm1, %v6531_v21  ;;  %4941 = vmatprep.mubr.msk.f32.mxu0 %vm209_vm1, %v5777_v55 }
 0x12a   : > { %4742 = vmatmul.mubr.msk.f32.gmra.mrb[22].mxu1 %vm209_vm1, %v6533_v22  ;;  %4942 = vmatmul.mubr.msk.f32.gmra.mrb[22].mxu0 %vm209_vm1, %v5791_v53 }
 0x12b   : > { %4744 = vmatprep.mubr.msk.f32.mxu1 %vm209_vm1, %v6535_v37  ;;  %4944 = vmatprep.mubr.msk.f32.mxu0 %vm209_vm1, %v5797_v49 }
 0x12e   : > { %4745 = vmatmul.mubr.msk.f32.gmra.mrb[24].mxu1 %vm209_vm1, %v6537_v33  ;;  %4945 = vmatmul.mubr.msk.f32.gmra.mrb[24].mxu0 %vm209_vm1, %v5811_v45 }
 0x12f   : > { %4747 = vmatprep.mubr.msk.f32.mxu1 %vm209_vm1, %v6539_v12  ;;  %4947 = vmatprep.mubr.msk.f32.mxu0 %vm209_vm1, %v5817_v41 }
 0x132   : > { %4748 = vmatmul.mubr.msk.f32.gmra.mrb[26].mxu1 %vm209_vm1, %v6541_v16  ;;  %4948 = vmatmul.mubr.msk.f32.gmra.mrb[26].mxu0 %vm209_vm1, %v6549_v26 }
 0x133   : > { %4750 = vmatprep.mubr.msk.f32.mxu1 %vm209_vm1, %v6543_v20  ;;  %4950 = vmatprep.mubr.msk.f32.mxu0 %vm209_vm1, %v6550_v27 }
 0x136   : > { %4751 = vmatmul.mubr.msk.f32.gmra.mrb[28].mxu1 %vm209_vm1, %v6551_v30  ;;  %4951 = vmatmul.mubr.msk.f32.gmra.mrb[28].mxu0 %vm209_vm1, %v6552_v31 }
 0x137   : > { %4753 = vmatprep.mubr.msk.f32.mxu1 %vm209_vm1, %v6165_v1  ;;  %4953 = vmatprep.mubr.msk.f32.mxu0 %vm209_vm1, %v4167_v29 }
 0x13a   : > { %4754 = vmatmul.mubr.msk.f32.gmra.mrb[30].mxu1 %vm209_vm1, %v6176_v14  ;;  %4954 = vmatmul.mubr.msk.f32.gmra.mrb[30].mxu0 %vm209_vm1, %v4168_v32 }
 0x1b1   : > { %v4660_v34 = vpop.f32.mrb[0].mxu1 }
 0x1b2   : > { %v1449_v35 = vpop.f32.mrb[1].mxu1 }
 0x1b5   : > { %v4663_v36 = vpop.f32.mrb[2].mxu1 }
 0x1b6   : > { %v1459_v38 = vpop.f32.mrb[3].mxu1 }
 0x1b9   : > { %v4666_v39 = vpop.f32.mrb[4].mxu1 }
 0x1ba   : > { %v1469_v40 = vpop.f32.mrb[5].mxu1 }
 0x1bd   : > { %v4669_v41 = vpop.f32.mrb[6].mxu1 }
 0x1be   : > { %v1479_v42 = vpop.f32.mrb[7].mxu1 }
 0x1c1   : > { %v4672_v43 = vpop.f32.mrb[8].mxu1 }
 0x1c2   : > { %v1489_v44 = vpop.f32.mrb[9].mxu1 }
 0x1c5   : > { %v4675_v45 = vpop.f32.mrb[10].mxu1 }
 0x1c6   : > { %v1499_v46 = vpop.f32.mrb[11].mxu1 }
 0x1c9   : > { %v4678_v47 = vpop.f32.mrb[12].mxu1 }
 0x1ca   : > { %v1509_v48 = vpop.f32.mrb[13].mxu1 }
 0x1cd   : > { %v4681_v49 = vpop.f32.mrb[14].mxu1 }
 0x1ce   : > { %v1519_v50 = vpop.f32.mrb[15].mxu1 }
 0x1d1   : > { %v4910_v51 = vpop.f32.mrb[0].mxu0 }
 0x1d2   : > { %v4958_v52 = vadd.f32 %v4910_v51, %v4660_v34  ;;  %v3400_v53 = vpop.f32.mrb[1].mxu0 }
 0x1d3   : > { %v4959_v54 = vadd.f32 %v3400_v53, %v1449_v35 }
 0x1d4   : > { %3593 = vst.msk [vmem:[%s6321_s27 + $0x8] sm:$0xff] %vm3591_vm2, %v4958_v52 }
 0x1d5   : > { %3592 = vst.msk [vmem:[%s6321_s27] sm:$0xff] %vm3591_vm2, %v4959_v54  ;;  %v4913_v56 = vpop.f32.mrb[2].mxu0 }
 0x1d6   : > { %v4960_v58 = vadd.f32 %v4913_v56, %v4663_v36  ;;  %v3410_v59 = vpop.f32.mrb[3].mxu0 }
 0x1d7   : > { %v4961_v60 = vadd.f32 %v3410_v59, %v1459_v38 }
 0x1d8   : > { %3595 = vst.msk [vmem:[%s6321_s27 + $0x18] sm:$0xff] %vm3591_vm2, %v4960_v58 }
 0x1d9   : > { %3594 = vst.msk [vmem:[%s6321_s27 + $0x10] sm:$0xff] %vm3591_vm2, %v4961_v60  ;;  %v4916_v62 = vpop.f32.mrb[4].mxu0 }
 0x1da   : > { %v4962_v63 = vadd.f32 %v4916_v62, %v4666_v39  ;;  %v3420_v0 = vpop.f32.mrb[5].mxu0 }
 0x1db   : > { %v4963_v2 = vadd.f32 %v3420_v0, %v1469_v40 }
 0x1dc   : > { %3597 = vst.msk [vmem:[%s6321_s27 + $0x28] sm:$0xff] %vm3591_vm2, %v4962_v63 }
 0x1dd   : > { %3596 = vst.msk [vmem:[%s6321_s27 + $0x20] sm:$0xff] %vm3591_vm2, %v4963_v2  ;;  %v4919_v4 = vpop.f32.mrb[6].mxu0 }
 0x1de   : > { %v4964_v5 = vadd.f32 %v4919_v4, %v4669_v41  ;;  %v3430_v6 = vpop.f32.mrb[7].mxu0 }
 0x1df   : > { %v4965_v7 = vadd.f32 %v3430_v6, %v1479_v42 }
 0x1e0   : > { %3599 = vst.msk [vmem:[%s6321_s27 + $0x38] sm:$0xff] %vm3591_vm2, %v4964_v5 }
 0x1e1   : > { %3598 = vst.msk [vmem:[%s6321_s27 + $0x30] sm:$0xff] %vm3591_vm2, %v4965_v7  ;;  %v4922_v9 = vpop.f32.mrb[8].mxu0 }
 0x1e2   : > { %v4966_v10 = vadd.f32 %v4922_v9, %v4672_v43  ;;  %v3440_v55 = vpop.f32.mrb[9].mxu0 }
 0x1e3   : > { %v4967_v57 = vadd.f32 %v3440_v55, %v1489_v44 }
 0x1e4   : > { %3601 = vst.msk [vmem:[%s6321_s27 + $0x48] sm:$0xff] %vm3591_vm2, %v4966_v10 }
 0x1e5   : > { %3600 = vst.msk [vmem:[%s6321_s27 + $0x40] sm:$0xff] %vm3591_vm2, %v4967_v57  ;;  %v4925_v28 = vpop.f32.mrb[10].mxu0 }
 0x1e6   : > { %v4968_v24 = vadd.f32 %v4925_v28, %v4675_v45  ;;  %v3450_v25 = vpop.f32.mrb[11].mxu0 }
 0x1e7   : > { %v4969_v8 = vadd.f32 %v3450_v25, %v1499_v46 }
 0x1e8   : > { %3603 = vst.msk [vmem:[%s6321_s27 + $0x58] sm:$0xff] %vm3591_vm2, %v4968_v24 }
 0x1e9   : > { %3602 = vst.msk [vmem:[%s6321_s27 + $0x50] sm:$0xff] %vm3591_vm2, %v4969_v8  ;;  %v4928_v11 = vpop.f32.mrb[12].mxu0 }
 0x1ea   : > { %v4970_v13 = vadd.f32 %v4928_v11, %v4678_v47  ;;  %v3460_v15 = vpop.f32.mrb[13].mxu0 }
 0x1eb   : > { %v4971_v17 = vadd.f32 %v3460_v15, %v1509_v48 }
 0x1ec   : > { %3605 = vst.msk [vmem:[%s6321_s27 + $0x68] sm:$0xff] %vm3591_vm2, %v4970_v13 }
 0x1ed   : > { %3604 = vst.msk [vmem:[%s6321_s27 + $0x60] sm:$0xff] %vm3591_vm2, %v4971_v17  ;;  %v4931_v19 = vpop.f32.mrb[14].mxu0 }
 0x1ee   : > { %v4972_v21 = vadd.f32 %v4931_v19, %v4681_v49  ;;  %v3470_v22 = vpop.f32.mrb[15].mxu0 }
 0x1ef   : > { %v4973_v37 = vadd.f32 %v3470_v22, %v1519_v50 }
 0x1f0   : > { %3607 = vst.msk [vmem:[%s6321_s27 + $0x78] sm:$0xff] %vm3591_vm2, %v4972_v21 }
 0x1f1   : > { %3606 = vst.msk [vmem:[%s6321_s27 + $0x70] sm:$0xff] %vm3591_vm2, %v4973_v37  ;;  %v4734_v33 = vpop.f32.mrb[16].mxu1  ;;  %v4934_v12 = vpop.f32.mrb[16].mxu0 }
 0x1f2   : > { %v4974_v16 = vadd.f32 %v4934_v12, %v4734_v33  ;;  %v1919_v20 = vpop.f32.mrb[17].mxu1  ;;  %v3480_v1 = vpop.f32.mrb[17].mxu0 }
 0x1f3   : > { %v4975_v3 = vadd.f32 %v3480_v1, %v1919_v20 }
 0x1f4   : > { %3609 = vst.msk [vmem:[%s6321_s27 + $0x88] sm:$0xff] %vm3591_vm2, %v4974_v16 }
 0x1f5   : > { %3608 = vst.msk [vmem:[%s6321_s27 + $0x80] sm:$0xff] %vm3591_vm2, %v4975_v3  ;;  %v4737_v61 = vpop.f32.mrb[18].mxu1  ;;  %v4937_v14 = vpop.f32.mrb[18].mxu0 }
 0x1f6   : > { %v4976_v18 = vadd.f32 %v4937_v14, %v4737_v61  ;;  %v1929_v23 = vpop.f32.mrb[19].mxu1  ;;  %v3490_v26 = vpop.f32.mrb[19].mxu0 }
 0x1f7   : > { %v4977_v27 = vadd.f32 %v3490_v26, %v1929_v23 }
 0x1f8   : > { %3611 = vst.msk [vmem:[%s6321_s27 + $0x98] sm:$0xff] %vm3591_vm2, %v4976_v18 }
 0x1f9   : > { %3610 = vst.msk [vmem:[%s6321_s27 + $0x90] sm:$0xff] %vm3591_vm2, %v4977_v27  ;;  %v4740_v29 = vpop.f32.mrb[20].mxu1  ;;  %v4940_v30 = vpop.f32.mrb[20].mxu0 }
 0x1fa   : > { %v4978_v31 = vadd.f32 %v4940_v30, %v4740_v29  ;;  %v1939_v32 = vpop.f32.mrb[21].mxu1  ;;  %v3500_v34 = vpop.f32.mrb[21].mxu0 }
 0x1fb   : > { %v4979_v35 = vadd.f32 %v3500_v34, %v1939_v32 }
 0x1fc   : > { %3613 = vst.msk [vmem:[%s6321_s27 + $0xa8] sm:$0xff] %vm3591_vm2, %v4978_v31 }
 0x1fd   : > { %3612 = vst.msk [vmem:[%s6321_s27 + $0xa0] sm:$0xff] %vm3591_vm2, %v4979_v35  ;;  %v4743_v36 = vpop.f32.mrb[22].mxu1  ;;  %v4943_v38 = vpop.f32.mrb[22].mxu0 }
 0x1fe   : > { %v4980_v39 = vadd.f32 %v4943_v38, %v4743_v36  ;;  %v1949_v40 = vpop.f32.mrb[23].mxu1  ;;  %v3510_v41 = vpop.f32.mrb[23].mxu0 }
 0x1ff   : > { %v4981_v42 = vadd.f32 %v3510_v41, %v1949_v40 }
 0x200   : > { %3615 = vst.msk [vmem:[%s6321_s27 + $0xb8] sm:$0xff] %vm3591_vm2, %v4980_v39 }
 0x201   : > { %3614 = vst.msk [vmem:[%s6321_s27 + $0xb0] sm:$0xff] %vm3591_vm2, %v4981_v42  ;;  %v4746_v43 = vpop.f32.mrb[24].mxu1  ;;  %v4946_v44 = vpop.f32.mrb[24].mxu0 }
 0x202   : > { %v4982_v45 = vadd.f32 %v4946_v44, %v4746_v43  ;;  %v1959_v46 = vpop.f32.mrb[25].mxu1  ;;  %v3520_v47 = vpop.f32.mrb[25].mxu0 }
 0x203   : > { %v4983_v48 = vadd.f32 %v3520_v47, %v1959_v46 }
 0x204   : > { %3617 = vst.msk [vmem:[%s6321_s27 + $0xc8] sm:$0xff] %vm3591_vm2, %v4982_v45 }
 0x205   : > { %3616 = vst.msk [vmem:[%s6321_s27 + $0xc0] sm:$0xff] %vm3591_vm2, %v4983_v48  ;;  %v4749_v49 = vpop.f32.mrb[26].mxu1  ;;  %v4949_v50 = vpop.f32.mrb[26].mxu0 }
 0x206   : > { %v4984_v51 = vadd.f32 %v4949_v50, %v4749_v49  ;;  %v1969_v52 = vpop.f32.mrb[27].mxu1  ;;  %v3530_v53 = vpop.f32.mrb[27].mxu0 }
 0x207   : > { %v4985_v54 = vadd.f32 %v3530_v53, %v1969_v52 }
 0x208   : > { %3619 = vst.msk [vmem:[%s6321_s27 + $0xd8] sm:$0xff] %vm3591_vm2, %v4984_v51 }
 0x209   : > { %3618 = vst.msk [vmem:[%s6321_s27 + $0xd0] sm:$0xff] %vm3591_vm2, %v4985_v54  ;;  %v4752_v56 = vpop.f32.mrb[28].mxu1  ;;  %v4952_v58 = vpop.f32.mrb[28].mxu0 }
 0x20a   : > { %v4986_v59 = vadd.f32 %v4952_v58, %v4752_v56  ;;  %v1979_v60 = vpop.f32.mrb[29].mxu1  ;;  %v3540_v62 = vpop.f32.mrb[29].mxu0 }
 0x20b   : > { %v4987_v63 = vadd.f32 %v3540_v62, %v1979_v60 }
 0x20c   : > { %3621 = vst.msk [vmem:[%s6321_s27 + $0xe8] sm:$0xff] %vm3591_vm2, %v4986_v59 }
 0x20d   : > { %3620 = vst.msk [vmem:[%s6321_s27 + $0xe0] sm:$0xff] %vm3591_vm2, %v4987_v63  ;;  %v4755_v0 = vpop.f32.mrb[30].mxu1  ;;  %v4955_v2 = vpop.f32.mrb[30].mxu0 }
 0x20e   : > { %v4988_v4 = vadd.f32 %v4955_v2, %v4755_v0  ;;  %v1989_v5 = vpop.f32.mrb[31].mxu1  ;;  %v3550_v6 = vpop.f32.mrb[31].mxu0 }
 0x20f   : > { %v4989_v7 = vadd.f32 %v3550_v6, %v1989_v5 }
 0x210   : > { %3623 = vst.msk [vmem:[%s6321_s27 + $0xf8] sm:$0xff] %vm3591_vm2, %v4988_v4 }
 0x211   : > { %3622 = vst.msk [vmem:[%s6321_s27 + $0xf0] sm:$0xff] %vm3591_vm2, %v4989_v7 }
 0x212   : > { %5269 = shalt.err (!%p5266_p3)
}
 0x213   : > { %s5270_s14 = scalar_lea.hbm %s6388_s4, 4096  ;;  %s5274_s21 = scalar_lea.hbm %s6441_s2, 8192 }
 0x214   : > { %p5271_p4 = scmp.ne.s32.totalorder %s6388_s4, %s5270_s14  ;;  %p5275_p9 = scmp.lt.u32.totalorder %s6388_s4, %s6441_s2 }
 0x215   : > { %p5276_p10 = scmp.lt.u32.totalorder %s5274_s21, %s5270_s14  ;;  %p5278_p12 = scmp.lt.u32.totalorder %s5270_s14, %s6388_s4 }
 0x216   : > { %p5272_p7 = pnand %p5271_p4, %p5376_p5 }
 0x217   : > { %p5277_p11 = por %p5276_p10, %p5275_p9 }
 0x218   : > { %p5273_p8 = pneg %p5272_p7 }
 0x219   : > { %p5279_p13 = por %p5278_p12, %p5277_p11 }
 0x21b   : > { %p5280_p0 = pnand %p5279_p13, %p5273_p8 }
 0x21d   : > { %5283 = shalt.err (!%p5280_p0)
}
 0x21e   : > { %s5321_s24 = smov 128   ;;  %s5322_s25 = smov 8  }
 0x21f   : > { %5215 = dma.vmem_to_hbm [thread:$0]  (%p5376_p5), %s6390_s29, 4096, %s6388_s4, %s6398_s13, %s5321_s24, %s5321_s24, %s5322_s25  }
 0x220 PF: > { %p5221_p1 = scmp.ge.s32.totalorder %s5318_s12, 2  ;;  %s3653_s26 = sand.u32 1, %s5306_s9  }
 0x221   : > { %s3654_s27 = scalar_lea.sflag [#allocation3], %s3653_s26 }
 0x222   : > { %p5218_p2 = pnand %p5221_p1, %p5380_p6 }
 0x224   : > { %5301 = dma.done.wait (!%p5218_p2), %s3654_s27, 4096  }
 0x225   : > { %5303 = vsyncadd (!%p5218_p2), %s3654_s27, 4294963200  ;;  %p12_p3 = scmp.ge.s32.totalorder %s5363_s15, 4   ;;  %s6553_s9 = smov %s5310_s10 }
 0x226   : > { %s6554_s10 = smov %s5314_s11  ;;  %s6555_s11 = smov %s5374_s18 }
 0x227   : > { %s6556_s12 = smov %s5363_s15  ;;  %14 = sbr.rel (!%p12_p3) target bundleno = 3 (0x3), region = 73 }
 0x22e   :  { %3659 = vsyncpa [#allocation3], 1 }
 0x22f   :  { %3661 = vsyncpa [#allocation3 + $0x1], 1 }

</bundles_post_ra>
